<compile_context>
chip_gen: v6e
topology: v6e:2x2x1
jax: 0.10.0
libtpu: 0.0.40
codegen_flags: <defaults>
</compile_context>

<pallas_src>
import functools

import jax
import jax.numpy as jnp
from jax.experimental import pallas as pl
from jax.experimental.pallas import tpu as pltpu


def self_attention_kernel(
    x_ref,
    ln1_g_ref, ln1_b_ref,
    wqkv_ref, bqkv_ref,
    wo_ref, bo_ref,
    ln2_g_ref, ln2_b_ref,
    w1_ref, b1_ref, w2_ref, b2_ref,
    out_ref,
    *, num_heads, q_block,
):
    x = x_ref[...]                     # (N, D) f32 — full sequence for this batch element
    N, D = x.shape
    H = num_heads
    dh = D // H
    TQ = q_block
    scale = 1.0 / (dh ** 0.5)
    eps = 1e-6

    # ---- LayerNorm 1 (pre-attention), f32 — full sequence (needed for K/V) ----
    mu = jnp.mean(x, axis=-1, keepdims=True)
    var = jnp.mean((x - mu) ** 2, axis=-1, keepdims=True)
    xn = (x - mu) * jax.lax.rsqrt(var + eps)
    xn = xn * ln1_g_ref[...] + ln1_b_ref[...]

    # ---- Fused Q/K/V projection: one (N, D) x (D, 3D) MXU push, bf16 operands, f32 acc ----
    qkv = jnp.dot(xn.astype(jnp.bfloat16), wqkv_ref[...],
                  preferred_element_type=jnp.float32) + bqkv_ref[...]     # (N, 3D) f32

    # Query rows for this grid step's block; K/V use the full sequence.
    if TQ == N:                        # static (trace-time) specialization
        q = qkv[:, 0:D]
        x_q = x
    else:
        q_start = pl.multiple_of(pl.program_id(1) * TQ, TQ)
        q = jax.lax.dynamic_slice(qkv, (q_start, 0), (TQ, D))
        x_q = jax.lax.dynamic_slice(x, (q_start, 0), (TQ, D))
    k = qkv[:, D:2 * D]
    v = qkv[:, 2 * D:3 * D]

    # ---- Multi-head attention: heads as a batch dim of a single dot_general ----
    q3 = jnp.transpose((q * scale).reshape(TQ, H, dh), (1, 0, 2)).astype(jnp.bfloat16)  # (H,TQ,dh)
    k3 = jnp.transpose(k.reshape(N, H, dh), (1, 0, 2)).astype(jnp.bfloat16)             # (H,N,dh)
    v3 = jnp.transpose(v.reshape(N, H, dh), (1, 0, 2)).astype(jnp.bfloat16)             # (H,N,dh)

    s = jax.lax.dot_general(q3, k3, (((2,), (2,)), ((0,), (0,))),
                            preferred_element_type=jnp.float32)            # (H, TQ, N) f32
    s = s - jnp.max(s, axis=-1, keepdims=True)
    p = jnp.exp(s)
    p = p * pl.reciprocal(jnp.sum(p, axis=-1, keepdims=True), approx=True)

    ctx = jax.lax.dot_general(p.astype(jnp.bfloat16), v3, (((2,), (1,)), ((0,), (0,))),
                              preferred_element_type=jnp.float32)          # (H, TQ, dh) f32
    ctx = jnp.transpose(ctx, (1, 0, 2)).reshape(TQ, D)                     # (TQ, D) f32

    # ---- Output projection + residual (dropout == identity in eval) ----
    attn_out = jnp.dot(ctx.astype(jnp.bfloat16), wo_ref[...],
                       preferred_element_type=jnp.float32) + bo_ref[...]
    out1 = attn_out + x_q

    # ---- FFN: LayerNorm -> Linear -> ReLU -> Linear -> residual ----
    mu2 = jnp.mean(out1, axis=-1, keepdims=True)
    var2 = jnp.mean((out1 - mu2) ** 2, axis=-1, keepdims=True)
    on = (out1 - mu2) * jax.lax.rsqrt(var2 + eps)
    on = on * ln2_g_ref[...] + ln2_b_ref[...]

    h1 = jnp.dot(on.astype(jnp.bfloat16), w1_ref[...],
                 preferred_element_type=jnp.float32) + b1_ref[...]
    h1 = jnp.maximum(h1, 0.0)
    y = jnp.dot(h1.astype(jnp.bfloat16), w2_ref[...],
                preferred_element_type=jnp.float32) + b2_ref[...]

    out_ref[...] = (y + out1).astype(out_ref.dtype)


def self_attention(x, params, num_heads=8, q_block=None):
    """x: (B, N, D) float32. params: ordered list (same layout as the PyTorch module)."""
    (ln1_g, ln1_b, wq, bq, wk, bk, wv, bv, wo, bo,
     ln2_g, ln2_b, w1, b1, w2, b2) = params
    B, N, D = x.shape

    if q_block is None:
        q_block = N if N <= 256 else 256
    assert N % q_block == 0
    if q_block != N:
        assert q_block % 8 == 0, "query block must be sublane-aligned when tiling N"

    # Fuse QKV weights/biases; cast matmul weights to bf16 (biases stay f32).
    wqkv = jnp.concatenate([wq, wk, wv], axis=1).astype(jnp.bfloat16)   # (D, 3D)
    bqkv = jnp.concatenate([bq, bk, bv], axis=1)                        # (1, 3D) f32
    wo_bf = wo.astype(jnp.bfloat16)
    w1_bf = w1.astype(jnp.bfloat16)
    w2_bf = w2.astype(jnp.bfloat16)

    kernel = functools.partial(self_attention_kernel,
                               num_heads=num_heads, q_block=q_block)

    def resident(arr):
        nd = arr.ndim
        return pl.BlockSpec(arr.shape, lambda b, qi, _nd=nd: (0,) * _nd)

    in_specs = [
        # full sequence of the current batch element (for K/V); leading dim squeezed
        pl.BlockSpec((pl.Squeezed(), N, D), lambda b, qi: (b, 0, 0)),
        resident(ln1_g), resident(ln1_b),
        resident(wqkv), resident(bqkv),
        resident(wo_bf), resident(bo),
        resident(ln2_g), resident(ln2_b),
        resident(w1_bf), resident(b1),
        resident(w2_bf), resident(b2),
    ]

    return pl.pallas_call(
        kernel,
        out_shape=jax.ShapeDtypeStruct((B, N, D), jnp.float32),
        grid=(B, N // q_block),
        in_specs=in_specs,
        out_specs=pl.BlockSpec((pl.Squeezed(), q_block, D), lambda b, qi: (b, qi, 0)),
        compiler_params=pltpu.CompilerParams(
            dimension_semantics=("parallel", "parallel")),
    )(x, ln1_g, ln1_b, wqkv, bqkv, wo_bf, bo, ln2_g, ln2_b, w1_bf, b1, w2_bf, b2)


def _reference(x, params, num_heads):
    """Pure-JAX f32 reference of the same forward pass (for a correctness check)."""
    (ln1_g, ln1_b, wq, bq, wk, bk, wv, bv, wo, bo,
     ln2_g, ln2_b, w1, b1, w2, b2) = params
    eps = 1e-6
    B, N, D = x.shape
    dh = D // num_heads

    def ln(t, g, b):
        mu = jnp.mean(t, -1, keepdims=True)
        var = jnp.mean((t - mu) ** 2, -1, keepdims=True)
        return (t - mu) / jnp.sqrt(var + eps) * g + b

    xn = ln(x, ln1_g, ln1_b)
    q = xn @ wq + bq
    k = xn @ wk + bk
    v = xn @ wv + bv
    q = q.reshape(B, N, num_heads, dh).transpose(0, 2, 1, 3) / (dh ** 0.5)
    k = k.reshape(B, N, num_heads, dh).transpose(0, 2, 1, 3)
    v = v.reshape(B, N, num_heads, dh).transpose(0, 2, 1, 3)
    s = jnp.einsum("bhnd,bhmd->bhnm", q, k)
    p = jax.nn.softmax(s, axis=-1)
    ctx = jnp.einsum("bhnm,bhmd->bhnd", p, v).transpose(0, 2, 1, 3).reshape(B, N, D)
    out1 = ctx @ wo + bo + x
    on = ln(out1, ln2_g, ln2_b)
    y = jnp.maximum(on @ w1 + b1, 0.0) @ w2 + b2
    return y + out1


if __name__ == "__main__":
    B, N, D = 2, 8, 32
    num_heads = 8
    ffn_dim = 4 * D

    key = jax.random.PRNGKey(0)
    keys = jax.random.split(key, 10)

    x = jax.random.normal(keys[0], (B, N, D), dtype=jnp.float32)

    def init_w(k, shape, scale=0.05):
        return (scale * jax.random.normal(k, shape)).astype(jnp.float32)

    params = [
        jnp.ones((1, D), jnp.float32),                 # ln1 gamma
        jnp.zeros((1, D), jnp.float32),                # ln1 beta
        init_w(keys[1], (D, D)), jnp.zeros((1, D), jnp.float32),        # Wq, bq
        init_w(keys[2], (D, D)), jnp.zeros((1, D), jnp.float32),        # Wk, bk
        init_w(keys[3], (D, D)), jnp.zeros((1, D), jnp.float32),        # Wv, bv
        init_w(keys[4], (D, D)), jnp.zeros((1, D), jnp.float32),        # Wo, bo
        jnp.ones((1, D), jnp.float32),                 # ln2 gamma (FFN layer norm)
        jnp.zeros((1, D), jnp.float32),                # ln2 beta
        init_w(keys[5], (D, ffn_dim)), jnp.zeros((1, ffn_dim), jnp.float32),  # W1, b1
        init_w(keys[6], (ffn_dim, D)), jnp.zeros((1, D), jnp.float32),        # W2, b2
    ]

    out = self_attention(x, params, num_heads=num_heads)
    out = jax.block_until_ready(out)

    ref = _reference(x, params, num_heads)
    assert out.shape == (B, N, D)
    # bf16 matmul operands (f32 accumulate) -> slightly looser tolerance than pure f32.
    assert jnp.allclose(out, ref, rtol=2e-2, atol=2e-2), "mismatch vs reference"

    print("KERNEL_OK")
</pallas_src>

<mosaic_0001>
module attributes {stable_mosaic.version = 11 : i64} {
  func.func @self_attention_kernel(%arg0: i32, %arg1: i32, %arg2: memref<1x8x32xf32, #tpu.memory_space<vmem>>, %arg3: memref<1x32xf32, #tpu.memory_space<vmem>>, %arg4: memref<1x32xf32, #tpu.memory_space<vmem>>, %arg5: memref<32x96xbf16, #tpu.memory_space<vmem>>, %arg6: memref<1x96xf32, #tpu.memory_space<vmem>>, %arg7: memref<32x32xbf16, #tpu.memory_space<vmem>>, %arg8: memref<1x32xf32, #tpu.memory_space<vmem>>, %arg9: memref<1x32xf32, #tpu.memory_space<vmem>>, %arg10: memref<1x32xf32, #tpu.memory_space<vmem>>, %arg11: memref<32x128xbf16, #tpu.memory_space<vmem>>, %arg12: memref<1x128xf32, #tpu.memory_space<vmem>>, %arg13: memref<128x32xbf16, #tpu.memory_space<vmem>>, %arg14: memref<1x32xf32, #tpu.memory_space<vmem>>, %arg15: memref<1x8x32xf32, #tpu.memory_space<vmem>>) attributes {dimension_semantics = [#tpu.dimension_semantics<parallel>, #tpu.dimension_semantics<parallel>], iteration_bounds = array<i64: 2, 1>, scalar_prefetch = 0 : i64, scratch_operands = 0 : i64, tpu.core_type = #tpu.core_type<tc>, window_params = [{transform_indices = @transform_0, window_bounds = array<i64: 1, 8, 32>}, {pipeline_mode = #tpu.pipeline_mode<synchronous>, transform_indices = @transform_1, window_bounds = array<i64: 1, 32>}, {pipeline_mode = #tpu.pipeline_mode<synchronous>, transform_indices = @transform_2, window_bounds = array<i64: 1, 32>}, {pipeline_mode = #tpu.pipeline_mode<synchronous>, transform_indices = @transform_3, window_bounds = array<i64: 32, 96>}, {pipeline_mode = #tpu.pipeline_mode<synchronous>, transform_indices = @transform_4, window_bounds = array<i64: 1, 96>}, {pipeline_mode = #tpu.pipeline_mode<synchronous>, transform_indices = @transform_5, window_bounds = array<i64: 32, 32>}, {pipeline_mode = #tpu.pipeline_mode<synchronous>, transform_indices = @transform_6, window_bounds = array<i64: 1, 32>}, {pipeline_mode = #tpu.pipeline_mode<synchronous>, transform_indices = @transform_7, window_bounds = array<i64: 1, 32>}, {pipeline_mode = #tpu.pipeline_mode<synchronous>, transform_indices = @transform_8, window_bounds = array<i64: 1, 32>}, {pipeline_mode = #tpu.pipeline_mode<synchronous>, transform_indices = @transform_9, window_bounds = array<i64: 32, 128>}, {pipeline_mode = #tpu.pipeline_mode<synchronous>, transform_indices = @transform_10, window_bounds = array<i64: 1, 128>}, {pipeline_mode = #tpu.pipeline_mode<synchronous>, transform_indices = @transform_11, window_bounds = array<i64: 128, 32>}, {pipeline_mode = #tpu.pipeline_mode<synchronous>, transform_indices = @transform_12, window_bounds = array<i64: 1, 32>}, {transform_indices = @transform_13, window_bounds = array<i64: 1, 8, 32>}]} {
    %c0 = arith.constant 0 : index
    %c0_0 = arith.constant 0 : index
    %c0_1 = arith.constant 0 : index
    %0 = vector.load %arg2[%c0, %c0_0, %c0_1] : memref<1x8x32xf32, #tpu.memory_space<vmem>>, vector<1x8x32xf32>
    %1 = vector.shape_cast %0 : vector<1x8x32xf32> to vector<8x32xf32>
    %cst = arith.constant dense<0.000000e+00> : vector<8xf32>
    %2 = vector.multi_reduction <add>, %1, %cst [1] : vector<8x32xf32> to vector<8xf32>
    %3 = vector.shape_cast %2 : vector<8xf32> to vector<8x1xf32>
    %cst_2 = arith.constant 3.200000e+01 : f32
    %4 = vector.broadcast %cst_2 : f32 to vector<8x1xf32>
    %5 = arith.divf %3, %4 : vector<8x1xf32>
    %6 = vector.broadcast %5 : vector<8x1xf32> to vector<8x32xf32>
    %7 = arith.subf %1, %6 : vector<8x32xf32>
    %8 = arith.mulf %7, %7 : vector<8x32xf32>
    %cst_3 = arith.constant dense<0.000000e+00> : vector<8xf32>
    %9 = vector.multi_reduction <add>, %8, %cst_3 [1] : vector<8x32xf32> to vector<8xf32>
    %10 = vector.shape_cast %9 : vector<8xf32> to vector<8x1xf32>
    %cst_4 = arith.constant 3.200000e+01 : f32
    %11 = vector.broadcast %cst_4 : f32 to vector<8x1xf32>
    %12 = arith.divf %10, %11 : vector<8x1xf32>
    %13 = vector.broadcast %5 : vector<8x1xf32> to vector<8x32xf32>
    %14 = arith.subf %1, %13 : vector<8x32xf32>
    %cst_5 = arith.constant 9.99999997E-7 : f32
    %15 = vector.broadcast %cst_5 : f32 to vector<8x1xf32>
    %16 = arith.addf %12, %15 : vector<8x1xf32>
    %17 = math.rsqrt %16 : vector<8x1xf32>
    %18 = vector.broadcast %17 : vector<8x1xf32> to vector<8x32xf32>
    %19 = arith.mulf %14, %18 : vector<8x32xf32>
    %c0_6 = arith.constant 0 : index
    %c0_7 = arith.constant 0 : index
    %20 = vector.load %arg3[%c0_6, %c0_7] : memref<1x32xf32, #tpu.memory_space<vmem>>, vector<1x32xf32>
    %21 = vector.broadcast %20 : vector<1x32xf32> to vector<8x32xf32>
    %22 = arith.mulf %19, %21 : vector<8x32xf32>
    %c0_8 = arith.constant 0 : index
    %c0_9 = arith.constant 0 : index
    %23 = vector.load %arg4[%c0_8, %c0_9] : memref<1x32xf32, #tpu.memory_space<vmem>>, vector<1x32xf32>
    %24 = vector.broadcast %23 : vector<1x32xf32> to vector<8x32xf32>
    %25 = arith.addf %22, %24 : vector<8x32xf32>
    %26 = arith.truncf %25 : vector<8x32xf32> to vector<8x32xbf16>
    %c0_10 = arith.constant 0 : index
    %c0_11 = arith.constant 0 : index
    %27 = vector.load %arg5[%c0_10, %c0_11] : memref<32x96xbf16, #tpu.memory_space<vmem>>, vector<32x96xbf16>
    %cst_12 = arith.constant dense<0.000000e+00> : vector<8x96xf32>
    %28 = tpu.matmul %26, %27, %cst_12 {dimension_numbers = #tpu.dot_dimension_numbers<[1], [0], [0], [1], [0, 0, 1, 1], [], []>} : vector<8x32xbf16>, vector<32x96xbf16>, vector<8x96xf32> -> vector<8x96xf32>
    %c0_13 = arith.constant 0 : index
    %c0_14 = arith.constant 0 : index
    %29 = vector.load %arg6[%c0_13, %c0_14] : memref<1x96xf32, #tpu.memory_space<vmem>>, vector<1x96xf32>
    %30 = vector.broadcast %29 : vector<1x96xf32> to vector<8x96xf32>
    %31 = arith.addf %28, %30 : vector<8x96xf32>
    %32 = vector.extract_strided_slice %31 {offsets = [0, 0], sizes = [8, 32], strides = [1, 1]} : vector<8x96xf32> to vector<8x32xf32>
    %33 = vector.extract_strided_slice %31 {offsets = [0, 32], sizes = [8, 32], strides = [1, 1]} : vector<8x96xf32> to vector<8x32xf32>
    %34 = vector.extract_strided_slice %31 {offsets = [0, 64], sizes = [8, 32], strides = [1, 1]} : vector<8x96xf32> to vector<8x32xf32>
    %cst_15 = arith.constant 5.000000e-01 : f32
    %35 = vector.broadcast %cst_15 : f32 to vector<8x32xf32>
    %36 = arith.mulf %32, %35 : vector<8x32xf32>
    %37 = vector.shape_cast %36 : vector<8x32xf32> to vector<8x8x4xf32>
    %38 = tpu.transpose %37, [1, 0, 2] : vector<8x8x4xf32> -> vector<8x8x4xf32>
    %39 = arith.truncf %38 : vector<8x8x4xf32> to vector<8x8x4xbf16>
    %40 = vector.shape_cast %33 : vector<8x32xf32> to vector<8x8x4xf32>
    %41 = tpu.transpose %40, [1, 0, 2] : vector<8x8x4xf32> -> vector<8x8x4xf32>
    %42 = arith.truncf %41 : vector<8x8x4xf32> to vector<8x8x4xbf16>
    %43 = vector.shape_cast %34 : vector<8x32xf32> to vector<8x8x4xf32>
    %44 = tpu.transpose %43, [1, 0, 2] : vector<8x8x4xf32> -> vector<8x8x4xf32>
    %45 = arith.truncf %44 : vector<8x8x4xf32> to vector<8x8x4xbf16>
    %cst_16 = arith.constant dense<0.000000e+00> : vector<8x8x8xf32>
    %46 = tpu.matmul %39, %42, %cst_16 {dimension_numbers = #tpu.dot_dimension_numbers<[2], [2], [1], [1], [0, 0, 0, 1, 1, 1], [0], [0]>} : vector<8x8x4xbf16>, vector<8x8x4xbf16>, vector<8x8x8xf32> -> vector<8x8x8xf32>
    %cst_17 = arith.constant dense<0xFF800000> : vector<8x8xf32>
    %47 = vector.multi_reduction <maximumf>, %46, %cst_17 [2] : vector<8x8x8xf32> to vector<8x8xf32>
    %48 = vector.shape_cast %47 : vector<8x8xf32> to vector<8x8x1xf32>
    %49 = vector.broadcast %48 : vector<8x8x1xf32> to vector<8x8x8xf32>
    %50 = arith.subf %46, %49 : vector<8x8x8xf32>
    %51 = math.exp %50 : vector<8x8x8xf32>
    %cst_18 = arith.constant dense<0.000000e+00> : vector<8x8xf32>
    %52 = vector.multi_reduction <add>, %51, %cst_18 [2] : vector<8x8x8xf32> to vector<8x8xf32>
    %53 = vector.shape_cast %52 : vector<8x8xf32> to vector<8x8x1xf32>
    %54 = tpu.reciprocal %53 {approx = true} : vector<8x8x1xf32> -> vector<8x8x1xf32>
    %55 = vector.broadcast %54 : vector<8x8x1xf32> to vector<8x8x8xf32>
    %56 = arith.mulf %51, %55 : vector<8x8x8xf32>
    %57 = arith.truncf %56 : vector<8x8x8xf32> to vector<8x8x8xbf16>
    %cst_19 = arith.constant dense<0.000000e+00> : vector<8x8x4xf32>
    %58 = tpu.matmul %57, %45, %cst_19 {dimension_numbers = #tpu.dot_dimension_numbers<[2], [1], [1], [2], [0, 0, 0, 1, 1, 2], [0], [0]>} : vector<8x8x8xbf16>, vector<8x8x4xbf16>, vector<8x8x4xf32> -> vector<8x8x4xf32>
    %59 = tpu.transpose %58, [1, 0, 2] : vector<8x8x4xf32> -> vector<8x8x4xf32>
    %60 = vector.shape_cast %59 : vector<8x8x4xf32> to vector<8x32xf32>
    %61 = arith.truncf %60 : vector<8x32xf32> to vector<8x32xbf16>
    %c0_20 = arith.constant 0 : index
    %c0_21 = arith.constant 0 : index
    %62 = vector.load %arg7[%c0_20, %c0_21] : memref<32x32xbf16, #tpu.memory_space<vmem>>, vector<32x32xbf16>
    %cst_22 = arith.constant dense<0.000000e+00> : vector<8x32xf32>
    %63 = tpu.matmul %61, %62, %cst_22 {dimension_numbers = #tpu.dot_dimension_numbers<[1], [0], [0], [1], [0, 0, 1, 1], [], []>} : vector<8x32xbf16>, vector<32x32xbf16>, vector<8x32xf32> -> vector<8x32xf32>
    %c0_23 = arith.constant 0 : index
    %c0_24 = arith.constant 0 : index
    %64 = vector.load %arg8[%c0_23, %c0_24] : memref<1x32xf32, #tpu.memory_space<vmem>>, vector<1x32xf32>
    %65 = vector.broadcast %64 : vector<1x32xf32> to vector<8x32xf32>
    %66 = arith.addf %63, %65 : vector<8x32xf32>
    %67 = arith.addf %66, %1 : vector<8x32xf32>
    %cst_25 = arith.constant dense<0.000000e+00> : vector<8xf32>
    %68 = vector.multi_reduction <add>, %67, %cst_25 [1] : vector<8x32xf32> to vector<8xf32>
    %69 = vector.shape_cast %68 : vector<8xf32> to vector<8x1xf32>
    %cst_26 = arith.constant 3.200000e+01 : f32
    %70 = vector.broadcast %cst_26 : f32 to vector<8x1xf32>
    %71 = arith.divf %69, %70 : vector<8x1xf32>
    %72 = vector.broadcast %71 : vector<8x1xf32> to vector<8x32xf32>
    %73 = arith.subf %67, %72 : vector<8x32xf32>
    %74 = arith.mulf %73, %73 : vector<8x32xf32>
    %cst_27 = arith.constant dense<0.000000e+00> : vector<8xf32>
    %75 = vector.multi_reduction <add>, %74, %cst_27 [1] : vector<8x32xf32> to vector<8xf32>
    %76 = vector.shape_cast %75 : vector<8xf32> to vector<8x1xf32>
    %cst_28 = arith.constant 3.200000e+01 : f32
    %77 = vector.broadcast %cst_28 : f32 to vector<8x1xf32>
    %78 = arith.divf %76, %77 : vector<8x1xf32>
    %79 = vector.broadcast %71 : vector<8x1xf32> to vector<8x32xf32>
    %80 = arith.subf %67, %79 : vector<8x32xf32>
    %cst_29 = arith.constant 9.99999997E-7 : f32
    %81 = vector.broadcast %cst_29 : f32 to vector<8x1xf32>
    %82 = arith.addf %78, %81 : vector<8x1xf32>
    %83 = math.rsqrt %82 : vector<8x1xf32>
    %84 = vector.broadcast %83 : vector<8x1xf32> to vector<8x32xf32>
    %85 = arith.mulf %80, %84 : vector<8x32xf32>
    %c0_30 = arith.constant 0 : index
    %c0_31 = arith.constant 0 : index
    %86 = vector.load %arg9[%c0_30, %c0_31] : memref<1x32xf32, #tpu.memory_space<vmem>>, vector<1x32xf32>
    %87 = vector.broadcast %86 : vector<1x32xf32> to vector<8x32xf32>
    %88 = arith.mulf %85, %87 : vector<8x32xf32>
    %c0_32 = arith.constant 0 : index
    %c0_33 = arith.constant 0 : index
    %89 = vector.load %arg10[%c0_32, %c0_33] : memref<1x32xf32, #tpu.memory_space<vmem>>, vector<1x32xf32>
    %90 = vector.broadcast %89 : vector<1x32xf32> to vector<8x32xf32>
    %91 = arith.addf %88, %90 : vector<8x32xf32>
    %92 = arith.truncf %91 : vector<8x32xf32> to vector<8x32xbf16>
    %c0_34 = arith.constant 0 : index
    %c0_35 = arith.constant 0 : index
    %93 = vector.load %arg11[%c0_34, %c0_35] : memref<32x128xbf16, #tpu.memory_space<vmem>>, vector<32x128xbf16>
    %cst_36 = arith.constant dense<0.000000e+00> : vector<8x128xf32>
    %94 = tpu.matmul %92, %93, %cst_36 {dimension_numbers = #tpu.dot_dimension_numbers<[1], [0], [0], [1], [0, 0, 1, 1], [], []>} : vector<8x32xbf16>, vector<32x128xbf16>, vector<8x128xf32> -> vector<8x128xf32>
    %c0_37 = arith.constant 0 : index
    %c0_38 = arith.constant 0 : index
    %95 = vector.load %arg12[%c0_37, %c0_38] : memref<1x128xf32, #tpu.memory_space<vmem>>, vector<1x128xf32>
    %96 = vector.broadcast %95 : vector<1x128xf32> to vector<8x128xf32>
    %97 = arith.addf %94, %96 : vector<8x128xf32>
    %cst_39 = arith.constant 0.000000e+00 : f32
    %98 = vector.broadcast %cst_39 : f32 to vector<8x128xf32>
    %99 = arith.maximumf %97, %98 : vector<8x128xf32>
    %100 = arith.truncf %99 : vector<8x128xf32> to vector<8x128xbf16>
    %c0_40 = arith.constant 0 : index
    %c0_41 = arith.constant 0 : index
    %101 = vector.load %arg13[%c0_40, %c0_41] : memref<128x32xbf16, #tpu.memory_space<vmem>>, vector<128x32xbf16>
    %cst_42 = arith.constant dense<0.000000e+00> : vector<8x32xf32>
    %102 = tpu.matmul %100, %101, %cst_42 {dimension_numbers = #tpu.dot_dimension_numbers<[1], [0], [0], [1], [0, 0, 1, 1], [], []>} : vector<8x128xbf16>, vector<128x32xbf16>, vector<8x32xf32> -> vector<8x32xf32>
    %c0_43 = arith.constant 0 : index
    %c0_44 = arith.constant 0 : index
    %103 = vector.load %arg14[%c0_43, %c0_44] : memref<1x32xf32, #tpu.memory_space<vmem>>, vector<1x32xf32>
    %104 = vector.broadcast %103 : vector<1x32xf32> to vector<8x32xf32>
    %105 = arith.addf %102, %104 : vector<8x32xf32>
    %106 = arith.addf %105, %67 : vector<8x32xf32>
    %c0_45 = arith.constant 0 : index
    %c0_46 = arith.constant 0 : index
    %c0_47 = arith.constant 0 : index
    %107 = vector.load %arg15[%c0_45, %c0_46, %c0_47] : memref<1x8x32xf32, #tpu.memory_space<vmem>>, vector<1x8x32xf32>
    %108 = vector.shape_cast %107 : vector<1x8x32xf32> to vector<8x32xf32>
    %109 = vector.shape_cast %106 : vector<8x32xf32> to vector<1x8x32xf32>
    tpu.vector_store %arg15[%c0_45, %c0_46, %c0_47], %109 {strides = array<i32>} : memref<1x8x32xf32, #tpu.memory_space<vmem>>, vector<1x8x32xf32>,
    return
  }
  func.func @transform_0(%arg0: i32, %arg1: i32) -> (i32, i32, i32) {
    %c0_i32 = arith.constant 0 : i32
    %c0_i32_0 = arith.constant 0 : i32
    %c0_i32_1 = arith.constant 0 : i32
    return %arg0, %c0_i32, %c0_i32_0 : i32, i32, i32
  }
  func.func @transform_1(%arg0: i32, %arg1: i32) -> (i32, i32) {
    %c0_i32 = arith.constant 0 : i32
    %c0_i32_0 = arith.constant 0 : i32
    %c0_i32_1 = arith.constant 0 : i32
    return %c0_i32, %c0_i32_0 : i32, i32
  }
  func.func @transform_2(%arg0: i32, %arg1: i32) -> (i32, i32) {
    %c0_i32 = arith.constant 0 : i32
    %c0_i32_0 = arith.constant 0 : i32
    %c0_i32_1 = arith.constant 0 : i32
    return %c0_i32, %c0_i32_0 : i32, i32
  }
  func.func @transform_3(%arg0: i32, %arg1: i32) -> (i32, i32) {
    %c0_i32 = arith.constant 0 : i32
    %c0_i32_0 = arith.constant 0 : i32
    %c0_i32_1 = arith.constant 0 : i32
    return %c0_i32, %c0_i32_0 : i32, i32
  }
  func.func @transform_4(%arg0: i32, %arg1: i32) -> (i32, i32) {
    %c0_i32 = arith.constant 0 : i32
    %c0_i32_0 = arith.constant 0 : i32
    %c0_i32_1 = arith.constant 0 : i32
    return %c0_i32, %c0_i32_0 : i32, i32
  }
  func.func @transform_5(%arg0: i32, %arg1: i32) -> (i32, i32) {
    %c0_i32 = arith.constant 0 : i32
    %c0_i32_0 = arith.constant 0 : i32
    %c0_i32_1 = arith.constant 0 : i32
    return %c0_i32, %c0_i32_0 : i32, i32
  }
  func.func @transform_6(%arg0: i32, %arg1: i32) -> (i32, i32) {
    %c0_i32 = arith.constant 0 : i32
    %c0_i32_0 = arith.constant 0 : i32
    %c0_i32_1 = arith.constant 0 : i32
    return %c0_i32, %c0_i32_0 : i32, i32
  }
  func.func @transform_7(%arg0: i32, %arg1: i32) -> (i32, i32) {
    %c0_i32 = arith.constant 0 : i32
    %c0_i32_0 = arith.constant 0 : i32
    %c0_i32_1 = arith.constant 0 : i32
    return %c0_i32, %c0_i32_0 : i32, i32
  }
  func.func @transform_8(%arg0: i32, %arg1: i32) -> (i32, i32) {
    %c0_i32 = arith.constant 0 : i32
    %c0_i32_0 = arith.constant 0 : i32
    %c0_i32_1 = arith.constant 0 : i32
    return %c0_i32, %c0_i32_0 : i32, i32
  }
  func.func @transform_9(%arg0: i32, %arg1: i32) -> (i32, i32) {
    %c0_i32 = arith.constant 0 : i32
    %c0_i32_0 = arith.constant 0 : i32
    %c0_i32_1 = arith.constant 0 : i32
    return %c0_i32, %c0_i32_0 : i32, i32
  }
  func.func @transform_10(%arg0: i32, %arg1: i32) -> (i32, i32) {
    %c0_i32 = arith.constant 0 : i32
    %c0_i32_0 = arith.constant 0 : i32
    %c0_i32_1 = arith.constant 0 : i32
    return %c0_i32, %c0_i32_0 : i32, i32
  }
  func.func @transform_11(%arg0: i32, %arg1: i32) -> (i32, i32) {
    %c0_i32 = arith.constant 0 : i32
    %c0_i32_0 = arith.constant 0 : i32
    %c0_i32_1 = arith.constant 0 : i32
    return %c0_i32, %c0_i32_0 : i32, i32
  }
  func.func @transform_12(%arg0: i32, %arg1: i32) -> (i32, i32) {
    %c0_i32 = arith.constant 0 : i32
    %c0_i32_0 = arith.constant 0 : i32
    %c0_i32_1 = arith.constant 0 : i32
    return %c0_i32, %c0_i32_0 : i32, i32
  }
  func.func @transform_13(%arg0: i32, %arg1: i32) -> (i32, i32, i32) {
    %c0_i32 = arith.constant 0 : i32
    %c0_i32_0 = arith.constant 0 : i32
    return %arg0, %arg1, %c0_i32 : i32, i32, i32
  }
}

</mosaic_0001>

<bundles_post_ra>
// kernel: tpu_custom_call.1
= control target key start
LH: loop header
LB: loop body
LE: loop exit
PB: predicated region body
PF: predicated region fallthrough
CT: control target
= control target key end

     0   :  { %s4148_s0 = inlined_call_operand.vmem [shape: f32[2,8,32], index: 0, kind: input, shape index: {}]   ;;  %s4149_s1 = inlined_call_operand.vmem [shape: f32[1,32], index: 1, kind: input, shape index: {}]   ;;  %s4150_s2 = inlined_call_operand.vmem [shape: f32[1,32], index: 2, kind: input, shape index: {}]   ;;  %s4151_s3 = inlined_call_operand.vmem [shape: bf16[32,96], index: 3, kind: input, shape index: {}]   ;;  %s4152_s4 = inlined_call_operand.vmem [shape: f32[1,96], index: 4, kind: input, shape index: {}]   ;;  %s4153_s5 = inlined_call_operand.vmem [shape: bf16[32,32], index: 5, kind: input, shape index: {}]   ;;  %s4154_s6 = inlined_call_operand.vmem [shape: f32[1,32], index: 6, kind: input, shape index: {}]   ;;  %s4155_s7 = inlined_call_operand.vmem [shape: f32[1,32], index: 7, kind: input, shape index: {}]   ;;  %s4156_s8 = inlined_call_operand.vmem [shape: f32[1,32], index: 8, kind: input, shape index: {}]   ;;  %s4157_s9 = inlined_call_operand.vmem [shape: bf16[32,128], index: 9, kind: input, shape index: {}]   ;;  %s4158_s10 = inlined_call_operand.vmem [shape: f32[1,128], index: 10, kind: input, shape index: {}]   ;;  %s4159_s11 = inlined_call_operand.vmem [shape: bf16[128,32], index: 11, kind: input, shape index: {}]   ;;  %s4160_s12 = inlined_call_operand.vmem [shape: f32[1,32], index: 12, kind: input, shape index: {}]   ;;  %s4161_s13 = inlined_call_operand.hbm [shape: f32[2,8,32], index: 13, kind: output, shape index: {}]  }
   0x1   :  { %4162 = sst [smem:[#allocation5_spill]] %s4148_s0 }
   0x2   :  { %4163 = sst [smem:[#allocation6_spill]] %s4149_s1 }
   0x3   :  { %4164 = sst [smem:[#allocation7_spill]] %s4150_s2 }
   0x4   :  { %4165 = sst [smem:[#allocation8_spill]] %s4151_s3 }
   0x5   :  { %18 = vsyncpa [#allocation3], 0 }
   0x6   :  { %20 = vsyncpa [#allocation3 + $0x1], 0  ;;  %s3554_s25 = smov 0   ;;  %s3556_s26 = smov 0  }
   0x7   :  { %s3558_s27 = smov 0   ;;  %s3560_s28 = smov 0  }
   0x8   :  { %s3562_s29 = smov 0   ;;  %s3564_s30 = smov 0  }
   0x9 LB: > { %s2985_s14 = sadd.s32 4294967295, %s3461_s30   ;;  %s2986_s15 = sadd.s32 4294967294, %s3461_s30   ;;  %s3461_s30 = sphi %s3564_s30, %s26_s30   ;;  %s3457_s29 = sphi %s3562_s29, %s4176_s29   ;;  %s3453_s28 = sphi %s3560_s28, %s4175_s28   ;;  %s3449_s27 = sphi %s3558_s27, %s4174_s27   ;;  %s3445_s26 = sphi %s3556_s26, %s4173_s26   ;;  %s3441_s25 = sphi %s3554_s25, %s4172_s25  }
   0xa   : > { %s38_s16 = sadd.s32 1, %s3457_s29  ;;  %s325_s17 = sadd.s32 1, %s3449_s27 }
   0xb   : > { %p40_p0 = scmp.ge.s32.totalorder %s38_s16, 2  ;;  %p335_p1 = scmp.ne.s32.totalorder %s3449_s27, %s3445_s26 }
   0xc   : > { %p336_p2 = scmp.eq.s32.totalorder %s2985_s14, 1  ;;  %p341_p3 = scmp.ne.s32.totalorder %s3445_s26, %s3441_s25 }
   0xd   : > { %s4178_s16 = smov (%p40_p0, %s38_s16), 0  ;;  %p342_p5 = scmp.eq.s32.totalorder %s2986_s15, 1 }
   0xe   : > { %p3594_p4 = por %p336_p2, %p335_p1  ;;  %s320_s19 = ssub.s32 %s3457_s29, %s4178_s16 }
   0xf   : > { %p2989_p6 = scmp.ge.s32.totalorder %s3461_s30, 1  ;;  %p323_p7 = scmp.eq.s32.totalorder %s320_s19, 0 }
  0x10   : > { %p3601_p8 = por %p342_p5, %p341_p3  ;;  %p403_p9 = scmp.lt.s32.totalorder %s3461_s30, 3 }
  0x11   : > { %s3607_s21 = scalar_select %p323_p7, %s3449_s27, %s325_s17  }
  0x12   : > { %p404_p10 = pnand %p2989_p6, %p403_p9 }
  0x13   : > { %p446_p11 = scmp.lt.s32.totalorder (!%p404_p10), %s3453_s28, 1  ;;  %s4168_s0 = sld [smem:[#allocation5_spill]] (!%p404_p10) }
  0x14   : > { %407 = sbr.rel (%p404_p10) target bundleno = 2641 (0xa51), region = 72  ;;  %s4169_s3 = sld [smem:[#allocation8_spill]] (!%p404_p10) }
  0x15   : > { %s4170_s1 = sld [smem:[#allocation6_spill]] (!%p404_p10)  ;;  %s3465_s24 = smov (!%p404_p10), 116  }
  0x16   : > { %s4171_s2 = sld [smem:[#allocation7_spill]] (!%p404_p10)  ;;  %s3466_s14 = smov (!%p404_p10), 124  }
  0x17   : > { %s3467_s17 = smov (!%p404_p10), 120   ;;  %s3468_s19 = smov (!%p404_p10), 112  }
  0x19   : > { %s447_s22 = scalar_select %p446_p11, %s3453_s28, 1  ;;  %vm452_vm0 = vcmask 261120   ;;  %v3463_v8 = vmov 0.0   ;;  %vm3464_vm1 = vmmov 0   ;;  %v2994_v20 = vld [vmem:[%s4152_s4] ss:$0 sm:$0xff]  ;;  %v578_v36 = vlaneseq }
  0x1a   : > { %v3334_v7 = vld [vmem:[%s4169_s3 + $0x8] sm:$0xff]   ;;  %3119 = vmatprep.subr.bf16.mxu0 %v3463_v8  ;;  %3123 = vmatprep.mubr.msk.bf16.mxu0 %vm3464_vm1, %v3463_v8  ;;  %v3335_v9 = vld [vmem:[%s4169_s3] sm:$0xff]   ;;  %v3474_v34 = vmov 1983009808   ;;  %v3475_v38 = vmov 1934713408  }
  0x1b   : > { %s2991_s23 = sshll.u32 %s447_s22, 3  ;;  %3120 = vmatpush3.bf16.msra.mxu0 %v3334_v7  ;;  %3139 = vmatprep.subr.bf16.mxu1 %v3463_v8  ;;  %v2992_v14 = vld [vmem:[%s4170_s1] ss:$0 sm:$0xff]  ;;  %s3470_s1 = smov 104   ;;  %v576_v35 = vunpack.c.l.s4 %v3474_v34  ;;  %v640_v39 = vunpack.c.l.s4 %v3475_v38  ;;  %v579_v41 = vshrl.u32 %v578_v36, 7  ;;  %vm1476_vm2 = vcmask 31744  }
  0x1c   : > { %s3614_s15 = scalar_lea.vmem %s4168_s0, %s2991_s23  ;;  %3121 = vmatprep.subr.bf16.mxu0 %v3463_v8  ;;  %3141 = vmatprep.mubr.msk.bf16.mxu1 %vm3464_vm1, %v3463_v8  ;;  %v2993_v16 = vld [vmem:[%s4171_s2] ss:$0 sm:$0xff]  ;;  %s3469_s0 = smov 108   ;;  %vm1945_vm3 = vcmask 1043456   ;;  %vm1845_vm4 = vcmask 64512   ;;  %vm2613_vm5 = vcmask 97280  }
  0x1d   : > { %v451_v0 = vld [vmem:[%s3614_s15] sm:$0xff]  ;;  %s3471_s22 = smov 100   ;;  %s3472_s23 = smov 96   ;;  %v577_v40 = vunpack.c.0.s8 %v576_v35  ;;  %v641_v43 = vunpack.c.0.s8 %v640_v39  ;;  %vm2615_vm6 = vcmask 130048   ;;  %vm2617_vm7 = vcmask 162816  }
  0x1e   : > { %v453_v1 = vsel %vm452_vm0, %v451_v0, 0.0  ;;  %vm2619_vm8 = vcmask 195584   ;;  %vm2621_vm9 = vcmask 228352  }
  0x1f   : > { %454 = vadd.xlane.f32.xlu0 %v453_v1  ;;  %3122 = vmatpush3.bf16.msra.mxu0 %v3335_v9  ;;  %v3672_v44 = vsub.s32 %v577_v40, %v579_v41  ;;  %v3674_v51 = vsub.s32 %v641_v43, %v579_v41 }
  0x20   : > { %3127 = vmatprep.subr.bf16.mxu0 %v3463_v8 }
  0xa8   : > { %v455_v2 = vpop.xlane.xlu0 %454 }
  0xa9   : > { %v457_v3 = vmul.f32 0.03125, %v455_v2 }
  0xab   : > { %v458_v4 = vsub.f32 %v451_v0, %v457_v3 }
  0xad   : > { %v459_v5 = vmul.f32 %v458_v4, %v458_v4 }
  0xaf   : > { %v460_v6 = vsel %vm452_vm0, %v459_v5, 0.0 }
  0xb0   : > { %461 = vadd.xlane.f32.xlu0 %v460_v6 }
 0x139   : > { %v462_v10 = vpop.xlane.xlu0 %461 }
 0x13a   : > { %v463_v11 = vmul.f32 0.03125, %v462_v10 }
 0x13c   : > { %v464_v12 = vadd.f32 1e-06, %v463_v11 }
 0x13e   : > { %3348 = vrsqrt.f32 %v464_v12 }
 0x14b   : > { %v3349_v13 = vpop.eup %3348 }
 0x14c   : > { %v466_v15 = vmul.f32 %v3349_v13, %v458_v4 }
 0x14e   : > { %v474_v17 = vmul.f32 %v2992_v14, %v466_v15 }
 0x150   : > { %v482_v18 = vadd.f32 %v2993_v16, %v474_v17 }
 0x152   : > { %v483_v19 = vpack.c.bf16 %v482_v18, %v482_v18 }
 0x154   : > { %3124 = vmatmul.mubr.msk.bf16.vlgmr.msra.gmra.mxu0 %vm452_vm0, %v483_v19 }
 0x155   : > { %3129 = vmatprep.mubr.msk.bf16.mxu0 %vm3464_vm1, %v3463_v8 }
 0x214   : > { %v544_v21 = vpop.f32.mrf.mxu0 }
 0x215   : > { %v545_v22 = vadd.f32 %v2994_v20, %v544_v21 }
 0x216   : > { %v3125_v23 = vpop.f32.mrf.mxu0 }
 0x217   : > { %858 = vrot.lane.b32.xlu0 %v545_v22, %s3465_s24  ;;  %854 = vrot.lane.b32.xlu1 %v545_v22, %s3466_s14  ;;  %v3646_v29 = vmul.f32 0.5, %v545_v22 }
 0x218   : > { %v547_v24 = vpop.f32.mrf.mxu0 }
 0x21a   : > { %v3126_v25 = vpop.f32.mrf.mxu0 }
 0x21b   : > { %856 = vrot.lane.b32.xlu1 %v545_v22, %s3467_s17 }
 0x21f   : > { %860 = vrot.lane.b32.xlu1 %v545_v22, %s3468_s19 }
 0x223   : > { %862 = vrot.lane.b32.xlu1 %v545_v22, %s3469_s0 }
 0x227   : > { %864 = vrot.lane.b32.xlu1 %v545_v22, %s3470_s1 }
 0x22b   : > { %866 = vrot.lane.b32.xlu1 %v545_v22, %s3471_s22 }
 0x22f   : > { %868 = vrot.lane.b32.xlu1 %v545_v22, %s3472_s23 }
 0x289   : > { %v855_v26 = vpop.permute.xlu1 %854  ;;  %v859_v27 = vpop.permute.xlu0 %858 }
 0x28a   : > { %870 = vrot.lane.b32.xlu1 %v855_v26, %s3472_s23 }
 0x28d   : > { %v857_v28 = vpop.permute.xlu1 %856 }
 0x28e   : > { %874 = vrot.lane.b32.xlu1 %v859_v27, %s3472_s23  ;;  %872 = vrot.lane.b32.xlu0 %v857_v28, %s3472_s23 }
 0x291   : > { %v3648_v30 = vpop.permute.xlu1 %860 }
 0x292   : > { %555 = vrot.lane.b32.xlu1 %v3646_v29, %s3467_s17  ;;  %552 = vrot.lane.b32.xlu0 %v3646_v29, %s3466_s14  ;;  %s3473_s14 = smov 64  }
 0x295   : > { %v3652_v31 = vpop.permute.xlu1 %862 }
 0x296   : > { %876 = vrot.lane.b32.xlu1 %v3648_v30, %s3472_s23  ;;  %558 = vrot.lane.b32.xlu0 %v3646_v29, %s3465_s24  ;;  %s3478_s24 = smov 12  }
 0x299   : > { %v3657_v32 = vpop.permute.xlu1 %864 }
 0x29a   : > { %880 = vrot.lane.b32.xlu1 %v3657_v32, %s3472_s23  ;;  %878 = vrot.lane.b32.xlu0 %v3652_v31, %s3472_s23 }
 0x29d   : > { %v3661_v33 = vpop.permute.xlu1 %866 }
 0x29e   : > { %561 = vrot.lane.b32.xlu1 %v3646_v29, %s3468_s19  ;;  %882 = vrot.lane.b32.xlu0 %v3661_v33, %s3472_s23  ;;  %s443_s19 = sand.u32 1, %s3445_s26   ;;  %s3483_s23 = smov [#allocation2]  }
 0x2a1   : > { %v869_v37 = vpop.permute.xlu1 %868 }
 0x2a2   : > { %567 = vrot.lane.b32.xlu1 %v3646_v29, %s3470_s1  ;;  %564 = vrot.lane.b32.xlu0 %v3646_v29, %s3469_s0  ;;  %s3476_s0 = smov 8   ;;  %s3477_s1 = smov 4  }
 0x2a6   : > { %1174 = vrot.lane.b32.xlu1 %v855_v26, %s3473_s14  ;;  %570 = vrot.lane.b32.xlu0 %v3646_v29, %s3471_s22  ;;  %s2990_s22 = sshll.u32 %s443_s19, 3 }
 0x2aa   : > { %1176 = vrot.lane.b32.xlu1 %v857_v28, %s3473_s14  ;;  %1172 = vrot.lane.b32.xlu0 %v545_v22, %s3473_s14 }
 0x2ae   : > { %1178 = vrot.lane.b32.xlu0 %v859_v27, %s3473_s14 }
 0x2fc   : > { %v871_v42 = vpop.permute.xlu1 %870 }
 0x300   : > { %v873_v45 = vpop.permute.xlu0 %872  ;;  %v875_v46 = vpop.permute.xlu1 %874 }
 0x301   : > { %v892_v47 = vcombine.low %v869_v37, %v873_v45  ;;  %v893_v48 = vcombine.high %v869_v37, %v873_v45  ;;  %v908_v49 = vcombine.low %v871_v42, %v875_v46  ;;  %v909_v50 = vcombine.high %v871_v42, %v875_v46 }
 0x303   : > { %v900_v52 = vrot.slane %v892_v47, %v3672_v44  ;;  %v907_v53 = vrot.slane %v893_v48, %v3672_v44  ;;  %v916_v54 = vrot.slane %v908_v49, %v3672_v44  ;;  %v923_v55 = vrot.slane %v909_v50, %v3672_v44 }
 0x304   : > { %v556_v56 = vpop.permute.xlu1 %555  ;;  %v553_v57 = vpop.permute.xlu0 %552 }
 0x305   : > { %v956_v58 = vcombine.low %v900_v52, %v916_v54  ;;  %v957_v59 = vcombine.high %v900_v52, %v916_v54  ;;  %v972_v60 = vcombine.low %v907_v53, %v923_v55  ;;  %v973_v61 = vcombine.high %v907_v53, %v923_v55 }
 0x306   : > { %v573_v2 = vcombine.low %v3646_v29, %v556_v56  ;;  %v574_v3 = vcombine.high %v3646_v29, %v556_v56 }
 0x307   : > { %v964_v62 = vrot.slane %v956_v58, %v3674_v51  ;;  %v971_v63 = vrot.slane %v957_v59, %v3674_v51  ;;  %v980_v0 = vrot.slane %v972_v60, %v3674_v51  ;;  %v987_v1 = vrot.slane %v973_v61, %v3674_v51 }
 0x308   : > { %v877_v4 = vpop.permute.xlu1 %876  ;;  %v559_v5 = vpop.permute.xlu0 %558  ;;  %v581_v17 = vrot.slane %v573_v2, %v3672_v44  ;;  %v588_v18 = vrot.slane %v574_v3, %v3672_v44 }
 0x309   : > { %v3006_v6 = vcombine.low %v964_v62, %v971_v63  ;;  %v3008_v7 = vcombine.high %v964_v62, %v971_v63  ;;  %v3010_v9 = vcombine.low %v980_v0, %v987_v1  ;;  %v3012_v10 = vcombine.high %v980_v0, %v987_v1 }
 0x30a   : > { %v589_v11 = vcombine.low %v553_v57, %v559_v5  ;;  %v590_v12 = vcombine.high %v553_v57, %v559_v5 }
 0x30b   : > { %v1036_v13 = vrot.slane %v3006_v6, %v3672_v44  ;;  %v1052_v14 = vrot.slane %v3008_v7, %v3672_v44  ;;  %v3689_v15 = vrot.slane %v3010_v9, %v3672_v44  ;;  %v3692_v16 = vrot.slane %v3012_v10, %v3672_v44 }
 0x30c   : > { %v597_v19 = vrot.slane %v589_v11, %v3672_v44  ;;  %v604_v20 = vrot.slane %v590_v12, %v3672_v44  ;;  %v881_v21 = vpop.permute.xlu1 %880  ;;  %v879_v22 = vpop.permute.xlu0 %878 }
 0x30d   : > { %v924_v23 = vcombine.low %v877_v4, %v881_v21  ;;  %v925_v24 = vcombine.high %v877_v4, %v881_v21  ;;  %v1092_v25 = vcombine.low %v1036_v13, %v1052_v14  ;;  %v1124_v26 = vcombine.low %v3689_v15, %v3692_v16 }
 0x30e   : > { %v637_v27 = vcombine.low %v581_v17, %v597_v19  ;;  %v638_v28 = vcombine.high %v581_v17, %v597_v19  ;;  %v653_v29 = vcombine.low %v588_v18, %v604_v20  ;;  %v654_v34 = vcombine.high %v588_v18, %v604_v20 }
 0x30f   : > { %v932_v35 = vrot.slane %v924_v23, %v3672_v44  ;;  %v3702_v36 = vrot.slane %v1092_v25, %v3674_v51  ;;  %v3705_v37 = vrot.slane %v1124_v26, %v3674_v51  ;;  %v939_v45 = vrot.slane %v925_v24, %v3672_v44 }
 0x310   : > { %v645_v38 = vrot.slane %v637_v27, %v3674_v51  ;;  %v652_v39 = vrot.slane %v638_v28, %v3674_v51  ;;  %v661_v40 = vrot.slane %v653_v29, %v3674_v51  ;;  %v668_v41 = vrot.slane %v654_v34, %v3674_v51  ;;  %v562_v42 = vpop.permute.xlu1 %561  ;;  %v883_v43 = vpop.permute.xlu0 %882 }
 0x311   : > { %v940_v46 = vcombine.low %v879_v22, %v883_v43  ;;  %v941_v47 = vcombine.high %v879_v22, %v883_v43  ;;  %v1156_v48 = vcombine.low %v3702_v36, %v3705_v37  ;;  %v1093_v57 = vcombine.high %v1036_v13, %v1052_v14 }
 0x312   : > { %v2998_v49 = vcombine.low %v645_v38, %v652_v39  ;;  %v3000_v50 = vcombine.high %v645_v38, %v652_v39  ;;  %v3002_v52 = vcombine.low %v661_v40, %v668_v41  ;;  %v3004_v53 = vcombine.high %v661_v40, %v668_v41 }
 0x313   : > { %v948_v54 = vrot.slane %v940_v46, %v3672_v44  ;;  %v955_v55 = vrot.slane %v941_v47, %v3672_v44  ;;  %v1164_v56 = vpack.c.bf16 %v1156_v48, %v1156_v48  ;;  %v3729_v14 = vrot.slane %v1093_v57, %v3674_v51 }
 0x314   : > { %v3717_v58 = vrot.slane %v2998_v49, %v3672_v44  ;;  %v733_v59 = vrot.slane %v3000_v50, %v3672_v44  ;;  %v749_v60 = vrot.slane %v3002_v52, %v3672_v44  ;;  %v765_v61 = vrot.slane %v3004_v53, %v3672_v44  ;;  %v568_v62 = vpop.permute.xlu1 %567  ;;  %v565_v63 = vpop.permute.xlu0 %564 }
 0x315   : > { %v988_v0 = vcombine.low %v932_v35, %v948_v54  ;;  %v989_v1 = vcombine.high %v932_v35, %v948_v54  ;;  %v1004_v2 = vcombine.low %v939_v45, %v955_v55  ;;  %v1005_v3 = vcombine.high %v939_v45, %v955_v55 }
 0x316   : > { %v773_v4 = vcombine.low %v3717_v58, %v733_v59  ;;  %v605_v5 = vcombine.low %v562_v42, %v568_v62  ;;  %v606_v6 = vcombine.high %v562_v42, %v568_v62  ;;  %v805_v12 = vcombine.low %v749_v60, %v765_v61 }
 0x317   : > { %v996_v7 = vrot.slane %v988_v0, %v3674_v51  ;;  %v1003_v9 = vrot.slane %v989_v1, %v3674_v51  ;;  %v1012_v10 = vrot.slane %v1004_v2, %v3674_v51  ;;  %v1019_v11 = vrot.slane %v1005_v3, %v3674_v51 }
 0x318   : > { %v1481_v13 = vsel %vm1476_vm2, %v1164_v56, 0  ;;  %v1125_v17 = vcombine.high %v3689_v15, %v3692_v16  ;;  %v3733_v18 = vpop.permute.xlu1 %1174  ;;  %v571_v19 = vpop.permute.xlu0 %570  ;;  %v613_v23 = vrot.slane %v605_v5, %v3672_v44  ;;  %v620_v16 = vrot.slane %v606_v6, %v3672_v44 }
 0x319   : > { %v3007_v20 = vcombine.low %v996_v7, %v1003_v9  ;;  %v3009_v21 = vcombine.high %v996_v7, %v1003_v9  ;;  %v3011_v22 = vcombine.low %v1012_v10, %v1019_v11  ;;  %3128 = vmatpush3.bf16.xpose.msra.mxu0 %v1481_v13  ;;  %v621_v25 = vcombine.low %v565_v63, %v571_v19 }
 0x31a   : > { %v3737_v24 = vrot.slane %v1125_v17, %v3674_v51  ;;  %v622_v26 = vcombine.high %v565_v63, %v571_v19  ;;  %3133 = vmatprep.subr.bf16.mxu0 %v3463_v8  ;;  %v3013_v15 = vcombine.high %v1012_v10, %v1019_v11  ;;  %v781_v28 = vrot.slane %v773_v4, %v3674_v51 }
 0x31b   : > { %v3741_v27 = vrot.slane %v3007_v20, %v3672_v44  ;;  %v629_v34 = vrot.slane %v621_v25, %v3672_v44  ;;  %v813_v40 = vrot.slane %v805_v12, %v3674_v51  ;;  %v3751_v41 = vrot.slane %v3009_v21, %v3672_v44 }
 0x31c   : > { %v1158_v29 = vcombine.low %v3729_v14, %v3737_v24  ;;  %v636_v35 = vrot.slane %v622_v26, %v3672_v44  ;;  %v1177_v38 = vpop.permute.xlu1 %1176  ;;  %v1173_v39 = vpop.permute.xlu0 %1172  ;;  %v3754_v42 = vrot.slane %v3011_v22, %v3672_v44  ;;  %v774_v43 = vcombine.high %v3717_v58, %v733_v59 }
 0x31d   : > { %v806_v45 = vcombine.high %v749_v60, %v765_v61  ;;  %v669_v47 = vcombine.low %v613_v23, %v629_v34  ;;  %v670_v48 = vcombine.high %v613_v23, %v629_v34  ;;  %v1196_v52 = vcombine.low %v1173_v39, %v1177_v38 }
 0x31e   : > { %v1166_v46 = vpack.c.bf16 %v1158_v29, %v1158_v29  ;;  %v685_v49 = vcombine.low %v620_v16, %v636_v35  ;;  %v686_v50 = vcombine.high %v620_v16, %v636_v35  ;;  %v1197_v53 = vcombine.high %v1173_v39, %v1177_v38 }
 0x31f   : > { %v837_v54 = vcombine.low %v781_v28, %v813_v40  ;;  %v677_v56 = vrot.slane %v669_v47, %v3674_v51  ;;  %v684_v57 = vrot.slane %v670_v48, %v3674_v51  ;;  %v3763_v60 = vrot.slane %v774_v43, %v3674_v51 }
 0x320   : > { %v1573_v55 = vsel %vm1476_vm2, %v1166_v46, 0  ;;  %v693_v62 = vrot.slane %v685_v49, %v3674_v51  ;;  %v1179_v63 = vpop.permute.xlu0 %1178  ;;  %v700_v58 = vrot.slane %v686_v50, %v3674_v51  ;;  %v820_v61 = vrot.slane %v806_v45, %v3674_v51 }
 0x321   : > { %3140 = vmatpush3.bf16.xpose.msra.mxu1 %v1573_v55  ;;  %v845_v59 = vpack.c.bf16 %v837_v54, %v837_v54  ;;  %v2999_v0 = vcombine.low %v677_v56, %v684_v57  ;;  %v3001_v1 = vcombine.high %v677_v56, %v684_v57  ;;  %v1157_v2 = vcombine.high %v3702_v36, %v3705_v37 }
 0x322   : > { %v1212_v3 = vcombine.low %v3733_v18, %v1179_v63  ;;  %3151 = vmatprep.subr.bf16.mxu1 %v3463_v8  ;;  %v3771_v4 = vrot.slane %v3013_v15, %v3672_v44  ;;  %v3003_v5 = vcombine.low %v693_v62, %v700_v58  ;;  %v3005_v6 = vcombine.high %v693_v62, %v700_v58 }
 0x323   : > { %3130 = vmatmul.mubr.msk.bf16.vlgmr.msra.gmra.mxu0 %vm1476_vm2, %v845_v59  ;;  %v839_v7 = vcombine.low %v3763_v60, %v820_v61  ;;  %v3776_v9 = vrot.slane %v2999_v0, %v3672_v44  ;;  %v3779_v10 = vrot.slane %v3001_v1, %v3672_v44  ;;  %v1165_v36 = vpack.c.bf16 %v1157_v2, %v1157_v2 }
 0x324   : > { %v1213_v37 = vcombine.high %v3733_v18, %v1179_v63  ;;  %3135 = vmatprep.mubr.msk.bf16.mxu0 %vm3464_vm1, %v3463_v8  ;;  %v1204_v11 = vrot.slane %v1196_v52, %v3672_v44  ;;  %v1211_v12 = vrot.slane %v1197_v53, %v3672_v44  ;;  %v1220_v17 = vrot.slane %v1212_v3, %v3672_v44 }
 0x325   : > { %v847_v13 = vpack.c.bf16 %v839_v7, %v839_v7  ;;  %v3788_v19 = vrot.slane %v3003_v5, %v3672_v44  ;;  %v3791_v20 = vrot.slane %v3005_v6, %v3672_v44  ;;  %v1527_v21 = vsel %vm1476_vm2, %v1165_v36, 0 }
 0x326   : > { %v1227_v18 = vrot.slane %v1213_v37, %v3672_v44  ;;  %v789_v22 = vcombine.low %v3776_v9, %v3779_v10  ;;  %3134 = vmatpush3.bf16.xpose.msra.mxu0 %v1527_v21  ;;  %v1260_v23 = vcombine.low %v1204_v11, %v1220_v17  ;;  %v1261_v25 = vcombine.high %v1204_v11, %v1220_v17 }
 0x327   : > { %v838_v16 = vcombine.high %v781_v28, %v813_v40  ;;  %3145 = vmatprep.subr.bf16.mxu0 %v3463_v8  ;;  %v1159_v35 = vcombine.high %v3729_v14, %v3737_v24  ;;  %v1108_v38 = vcombine.low %v3741_v27, %v3751_v41  ;;  %v821_v39 = vcombine.low %v3788_v19, %v3791_v20 }
 0x328   : > { %3142 = vmatmul.mubr.msk.bf16.vlgmr.msra.gmra.mxu1 %vm1476_vm2, %v847_v13  ;;  %v1276_v26 = vcombine.low %v1211_v12, %v1227_v18  ;;  %v1277_v15 = vcombine.high %v1211_v12, %v1227_v18  ;;  %v1268_v29 = vrot.slane %v1260_v23, %v3674_v51  ;;  %v1275_v34 = vrot.slane %v1261_v25, %v3674_v51 }
 0x329   : > { %3153 = vmatprep.mubr.msk.bf16.mxu1 %vm3464_vm1, %v3463_v8  ;;  %v1140_v43 = vcombine.low %v3754_v42, %v3771_v4  ;;  %v1167_v47 = vpack.c.bf16 %v1159_v35, %v1159_v35  ;;  %v1116_v14 = vrot.slane %v1108_v38, %v3674_v51  ;;  %v846_v49 = vpack.c.bf16 %v838_v16, %v838_v16 }
 0x32a   : > { %v1284_v28 = vrot.slane %v1276_v26, %v3674_v51  ;;  %v1291_v40 = vrot.slane %v1277_v15, %v3674_v51  ;;  %v3014_v45 = vcombine.low %v1268_v29, %v1275_v34  ;;  %v3016_v46 = vcombine.high %v1268_v29, %v1275_v34 }
 0x32b   : > { %v1148_v50 = vrot.slane %v1140_v43, %v3674_v51  ;;  %v797_v53 = vrot.slane %v789_v22, %v3674_v51  ;;  %v1619_v55 = vsel %vm1476_vm2, %v1167_v47, 0  ;;  %v829_v57 = vrot.slane %v821_v39, %v3674_v51 }
 0x32c   : > { %v3018_v24 = vcombine.low %v1284_v28, %v1291_v40  ;;  %v3020_v48 = vcombine.high %v1284_v28, %v1291_v40  ;;  %v1340_v52 = vrot.slane %v3014_v45, %v3672_v44  ;;  %v1356_v54 = vrot.slane %v3016_v46, %v3672_v44 }
 0x32d   : > { %3136 = vmatmul.mubr.msk.bf16.vlgmr.msra.gmra.mxu0 %vm1476_vm2, %v846_v49  ;;  %v1160_v56 = vcombine.low %v1116_v14, %v1148_v50  ;;  %v1161_v62 = vcombine.high %v1116_v14, %v1148_v50  ;;  %v1109_v63 = vcombine.high %v3741_v27, %v3751_v41  ;;  %v1141_v58 = vcombine.high %v3754_v42, %v3771_v4 }
 0x32e   : > { %3146 = vmatpush3.bf16.xpose.msra.mxu0 %v1619_v55  ;;  %3147 = vmatprep.mubr.msk.bf16.mxu0 %vm3464_vm1, %v3463_v8  ;;  %v840_v59 = vcombine.high %v3763_v60, %v820_v61  ;;  %v1372_v0 = vrot.slane %v3018_v24, %v3672_v44  ;;  %v1388_v1 = vrot.slane %v3020_v48, %v3672_v44 }
 0x32f   : > { %v1168_v2 = vpack.c.bf16 %v1160_v56, %v1160_v56  ;;  %3157 = vmatprep.subr.bf16.mxu0 %v3463_v8  ;;  %v841_v3 = vcombine.low %v797_v53, %v829_v57  ;;  %v1169_v5 = vpack.c.bf16 %v1161_v62, %v1161_v62  ;;  %v1123_v6 = vrot.slane %v1109_v63, %v3674_v51 }
 0x330   : > { %v1155_v7 = vrot.slane %v1141_v58, %v3674_v51  ;;  %v1396_v41 = vcombine.low %v1340_v52, %v1356_v54  ;;  %v790_v42 = vcombine.high %v3776_v9, %v3779_v10  ;;  %v822_v60 = vcombine.high %v3788_v19, %v3791_v20 }
 0x331   : > { %v1665_v27 = vsel %vm1476_vm2, %v1168_v2, 0  ;;  %v848_v4 = vpack.c.bf16 %v840_v59, %v840_v59  ;;  %v1428_v37 = vcombine.low %v1372_v0, %v1388_v1  ;;  %v1397_v11 = vcombine.high %v1340_v52, %v1356_v54 }
 0x332   : > { %3152 = vmatpush3.bf16.xpose.msra.mxu1 %v1665_v27  ;;  %v1162_v61 = vcombine.low %v1123_v6, %v1155_v7  ;;  %v1404_v36 = vrot.slane %v1396_v41, %v3674_v51  ;;  %v849_v12 = vpack.c.bf16 %v841_v3, %v841_v3  ;;  %v1711_v13 = vsel %vm1476_vm2, %v1169_v5, 0 }
 0x333   : > { %3163 = vmatprep.subr.bf16.mxu1 %v3463_v8  ;;  %v1429_v17 = vcombine.high %v1372_v0, %v1388_v1  ;;  %v1163_v9 = vcombine.high %v1123_v6, %v1155_v7  ;;  %v1436_v10 = vrot.slane %v1428_v37, %v3674_v51  ;;  %v1411_v19 = vrot.slane %v1397_v11, %v3674_v51 }
 0x334   : > { %v1170_v21 = vpack.c.bf16 %v1162_v61, %v1162_v61  ;;  %v842_v18 = vcombine.high %v797_v53, %v829_v57  ;;  %v804_v22 = vrot.slane %v790_v42, %v3674_v51  ;;  %v836_v23 = vrot.slane %v822_v60, %v3674_v51 }
 0x335   : > { %3148 = vmatmul.mubr.msk.bf16.vlgmr.msra.gmra.mxu0 %vm1476_vm2, %v848_v4  ;;  %v1443_v20 = vrot.slane %v1429_v17, %v3674_v51  ;;  %v1460_v25 = vcombine.low %v1404_v36, %v1436_v10  ;;  %v1171_v29 = vpack.c.bf16 %v1163_v9, %v1163_v9  ;;  %v1461_v28 = vcombine.high %v1404_v36, %v1436_v10 }
 0x336   : > { %3158 = vmatpush3.bf16.xpose.msra.mxu0 %v1711_v13  ;;  %3159 = vmatprep.mubr.msk.bf16.mxu0 %vm3464_vm1, %v3463_v8  ;;  %v1757_v16 = vsel %vm1476_vm2, %v1170_v21, 0  ;;  %v850_v34 = vpack.c.bf16 %v842_v18, %v842_v18  ;;  %v843_v35 = vcombine.low %v804_v22, %v836_v23  ;;  %v844_v45 = vcombine.high %v804_v22, %v836_v23 }
 0x337   : > { %3169 = vmatprep.subr.bf16.mxu0 %v3463_v8  ;;  %v3850_v26 = vcombine.low %v1411_v19, %v1443_v20  ;;  %v3852_v15 = vcombine.high %v1411_v19, %v1443_v20  ;;  %v1468_v38 = vpack.c.bf16 %v1460_v25, %v1460_v25  ;;  %v1803_v39 = vsel %vm1476_vm2, %v1171_v29, 0 }
 0x338   : > { %v851_v40 = vpack.c.bf16 %v843_v35, %v843_v35  ;;  %v1469_v46 = vpack.c.bf16 %v1461_v28, %v1461_v28  ;;  %v852_v47 = vpack.c.bf16 %v844_v45, %v844_v45 }
 0x339   : > { %3154 = vmatmul.mubr.msk.bf16.vlgmr.msra.gmra.mxu1 %vm1476_vm2, %v849_v12  ;;  %v1947_v43 = vsel %vm1945_vm3, %v1468_v38, 0 }
 0x33a   : > { %3164 = vmatpush3.bf16.xpose.msra.mxu1 %v1757_v16  ;;  %3165 = vmatprep.mubr.msk.bf16.mxu1 %vm3464_vm1, %v3463_v8  ;;  %v1993_v14 = vsel %vm1945_vm3, %v1469_v46, 0 }
 0x33b   : > { %3175 = vmatprep.subr.bf16.mxu1 %v3463_v8 }
 0x33d   : > { %3160 = vmatmul.mubr.msk.bf16.vlgmr.msra.gmra.mxu0 %vm1476_vm2, %v850_v34 }
 0x33e   : > { %3170 = vmatpush3.bf16.xpose.msra.mxu0 %v1803_v39  ;;  %3171 = vmatprep.mubr.msk.bf16.mxu0 %vm3464_vm1, %v3463_v8 }
 0x33f   : > { %3181 = vmatprep.subr.bf16.mxu0 %v3463_v8 }
 0x341   : > { %3166 = vmatmul.mubr.msk.bf16.vlgmr.msra.gmra.mxu1 %vm1476_vm2, %v851_v40 }
 0x342   : > { %3176 = vmatpush3.bf16.msra.mxu1 %v1947_v43  ;;  %3177 = vmatprep.mubr.msk.bf16.mxu1 %vm3464_vm1, %v3463_v8 }
 0x343   : > { %3187 = vmatprep.subr.bf16.mxu1 %v3463_v8 }
 0x345   : > { %3172 = vmatmul.mubr.msk.bf16.vlgmr.msra.gmra.mxu0 %vm1476_vm2, %v852_v47 }
 0x346   : > { %3182 = vmatpush3.bf16.msra.mxu0 %v1993_v14  ;;  %3183 = vmatprep.mubr.msk.bf16.mxu0 %vm3464_vm1, %v3463_v8 }
 0x347   : > { %3193 = vmatprep.subr.bf16.mxu0 %v3463_v8 }
 0x3e3   : > { %v1517_v24 = vpop.f32.mrf.mxu0 }
 0x3e4   : > { %v1846_v48 = vsel %vm1845_vm4, %v1517_v24, -inf }
 0x3e5   : > { %1847 = vmax.xlane.f32.xlu1 %v1846_v48  ;;  %v3131_v49 = vpop.f32.mrf.mxu0 }
 0x3e7   : > { %v1520_v50 = vpop.f32.mrf.mxu0 }
 0x3e8   : > { %v1609_v52 = vpop.f32.mrf.mxu1 }
 0x3e9   : > { %v1852_v53 = vsel %vm1845_vm4, %v1609_v52, -inf  ;;  %v3132_v54 = vpop.f32.mrf.mxu0 }
 0x3ea   : > { %1853 = vmax.xlane.f32.xlu0 %v1852_v53  ;;  %v3143_v55 = vpop.f32.mrf.mxu1 }
 0x3ec   : > { %v1612_v56 = vpop.f32.mrf.mxu1 }
 0x3ed   : > { %v1563_v62 = vpop.f32.mrf.mxu0 }
 0x3ee   : > { %v3144_v57 = vpop.f32.mrf.mxu1  ;;  %v1849_v63 = vsel %vm1845_vm4, %v1563_v62, -inf }
 0x3ef   : > { %1850 = vmax.xlane.f32.xlu0 %v1849_v63  ;;  %v3137_v58 = vpop.f32.mrf.mxu0 }
 0x3f1   : > { %v1566_v59 = vpop.f32.mrf.mxu0 }
 0x3f3   : > { %v3138_v0 = vpop.f32.mrf.mxu0 }
 0x3f5   : > { %v1655_v1 = vpop.f32.mrf.mxu0 }
 0x3f6   : > { %v1855_v2 = vsel %vm1845_vm4, %v1655_v1, -inf }
 0x3f7   : > { %1856 = vmax.xlane.f32.xlu1 %v1855_v2  ;;  %v3149_v3 = vpop.f32.mrf.mxu0 }
 0x3f9   : > { %v1701_v5 = vpop.f32.mrf.mxu1  ;;  %v1658_v6 = vpop.f32.mrf.mxu0 }
 0x3fa   : > { %v1858_v7 = vsel %vm1845_vm4, %v1701_v5, -inf }
 0x3fb   : > { %v3155_v27 = vpop.f32.mrf.mxu1  ;;  %1859 = vmax.xlane.f32.xlu0 %v1858_v7  ;;  %v3150_v41 = vpop.f32.mrf.mxu0 }
 0x3fd   : > { %v1704_v42 = vpop.f32.mrf.mxu1  ;;  %v1747_v60 = vpop.f32.mrf.mxu0 }
 0x3fe   : > { %v1861_v61 = vsel %vm1845_vm4, %v1747_v60, -inf }
 0x3ff   : > { %v3156_v4 = vpop.f32.mrf.mxu1  ;;  %1862 = vmax.xlane.f32.xlu1 %v1861_v61  ;;  %v3161_v36 = vpop.f32.mrf.mxu0 }
 0x401   : > { %v3880_v37 = vpop.f32.mrf.mxu1  ;;  %v1750_v11 = vpop.f32.mrf.mxu0 }
 0x402   : > { %v1864_v12 = vsel %vm1845_vm4, %v3880_v37, -inf }
 0x403   : > { %v3167_v13 = vpop.f32.mrf.mxu1  ;;  %1865 = vmax.xlane.f32.xlu0 %v1864_v12  ;;  %v3162_v17 = vpop.f32.mrf.mxu0 }
 0x405   : > { %v1796_v21 = vpop.f32.mrf.mxu1  ;;  %v1839_v9 = vpop.f32.mrf.mxu0 }
 0x406   : > { %v1867_v10 = vsel %vm1845_vm4, %v1839_v9, -inf }
 0x407   : > { %v3168_v19 = vpop.f32.mrf.mxu1  ;;  %1868 = vmax.xlane.f32.xlu1 %v1867_v10  ;;  %v3173_v20 = vpop.f32.mrf.mxu0 }
 0x409   : > { %v1842_v18 = vpop.f32.mrf.mxu0 }
 0x40b   : > { %v3174_v22 = vpop.f32.mrf.mxu0 }
 0x418   : > { %1182 = vrot.lane.b32.xlu1 %v3652_v31, %s3473_s14 }
 0x419   : > { %1180 = vrot.lane.b32.xlu0 %v3648_v30, %s3473_s14 }
 0x46e   : > { %v1848_v23 = vpop.xlane.xlu1 %1847 }
 0x46f   : > { %v1870_v25 = vsub.f32 %v1517_v24, %v1848_v23 }
 0x471   : > { %v1878_v16 = vmul.f32 1.442695, %v1870_v25 }
 0x473   : > { %v1854_v29 = vpop.xlane.xlu0 %1853  ;;  %3350 = vpow2.f32 %v1878_v16 }
 0x474   : > { %v1872_v34 = vsub.f32 %v1609_v52, %v1854_v29 }
 0x476   : > { %v1882_v35 = vmul.f32 1.442695, %v1872_v34 }
 0x478   : > { %3352 = vpow2.f32 %v1882_v35  ;;  %v1851_v38 = vpop.xlane.xlu0 %1850 }
 0x479   : > { %v1871_v39 = vsub.f32 %v1563_v62, %v1851_v38 }
 0x47b   : > { %v1880_v28 = vmul.f32 1.442695, %v1871_v39 }
 0x47d   : > { %3354 = vpow2.f32 %v1880_v28 }
 0x480   : > { %v3351_v40 = vpop.eup %3350  ;;  %v1857_v43 = vpop.xlane.xlu1 %1856 }
 0x481   : > { %v1894_v45 = vsel %vm1845_vm4, %v3351_v40, 0.0  ;;  %v1873_v31 = vsub.f32 %v1655_v1, %v1857_v43 }
 0x482   : > { %1895 = vadd.xlane.f32.xlu0 %v1894_v45 }
 0x483   : > { %v1884_v48 = vmul.f32 1.442695, %v1873_v31 }
 0x484   : > { %v1860_v30 = vpop.xlane.xlu0 %1859 }
 0x485   : > { %v3353_v46 = vpop.eup %3352  ;;  %v1874_v47 = vsub.f32 %v1701_v5, %v1860_v30 }
 0x486   : > { %v1900_v14 = vsel %vm1845_vm4, %v3353_v46, 0.0 }
 0x487   : > { %1901 = vadd.xlane.f32.xlu1 %v1900_v14  ;;  %v1886_v24 = vmul.f32 1.442695, %v1874_v47 }
 0x488   : > { %v1863_v49 = vpop.xlane.xlu1 %1862 }
 0x489   : > { %3356 = vpow2.f32 %v1886_v24  ;;  %v1875_v50 = vsub.f32 %v1747_v60, %v1863_v49 }
 0x48a   : > { %v3355_v52 = vpop.eup %3354  ;;  %3358 = vpow2.f32 %v1884_v48 }
 0x48b   : > { %v1888_v53 = vmul.f32 1.442695, %v1875_v50  ;;  %v1897_v54 = vsel %vm1845_vm4, %v3355_v52, 0.0 }
 0x48c   : > { %1898 = vadd.xlane.f32.xlu1 %v1897_v54  ;;  %v1866_v59 = vpop.xlane.xlu0 %1865 }
 0x48d   : > { %3360 = vpow2.f32 %v1888_v53  ;;  %v1876_v1 = vsub.f32 %v3880_v37, %v1866_v59  ;;  %v1470_v37 = vpack.c.bf16 %v3850_v26, %v3850_v26  ;;  %v1471_v26 = vpack.c.bf16 %v3852_v15, %v3852_v15 }
 0x48f   : > { %v1890_v3 = vmul.f32 1.442695, %v1876_v1  ;;  %v2039_v13 = vsel %vm1945_vm3, %v1470_v37, 0  ;;  %v2085_v23 = vsel %vm1945_vm3, %v1471_v26, 0 }
 0x490   : > { %v1869_v0 = vpop.xlane.xlu1 %1868 }
 0x491   : > { %v1877_v2 = vsub.f32 %v1839_v9, %v1869_v0  ;;  %3362 = vpow2.f32 %v1890_v3 }
 0x493   : > { %v1892_v5 = vmul.f32 1.442695, %v1877_v2 }
 0x494   : > { %v1183_v42 = vpop.permute.xlu1 %1182 }
 0x495   : > { %3364 = vpow2.f32 %v1892_v5 }
 0x496   : > { %v3892_v55 = vpop.eup %3356 }
 0x497   : > { %v1906_v56 = vsel %vm1845_vm4, %v3892_v55, 0.0  ;;  %v3896_v57 = vpop.eup %3358 }
 0x498   : > { %1907 = vadd.xlane.f32.xlu0 %v1906_v56  ;;  %v1903_v63 = vsel %vm1845_vm4, %v3896_v57, 0.0 }
 0x49a   : > { %v3898_v62 = vpop.eup %3360 }
 0x49b   : > { %v1909_v58 = vsel %vm1845_vm4, %v3898_v62, 0.0 }
 0x49c   : > { %1904 = vadd.xlane.f32.xlu0 %v1903_v63  ;;  %1910 = vadd.xlane.f32.xlu1 %v1909_v58 }
 0x49e   : > { %v3909_v6 = vpop.eup %3362 }
 0x4a2   : > { %v3911_v7 = vpop.eup %3364 }
 0x4a3   : > { %v1915_v27 = vsel %vm1845_vm4, %v3911_v7, 0.0 }
 0x4ad   : > { %1184 = vrot.lane.b32.xlu1 %v3657_v32, %s3473_s14  ;;  %v1912_v32 = vsel %vm1845_vm4, %v3909_v6, 0.0 }
 0x4b2   : > { %1186 = vrot.lane.b32.xlu0 %v3661_v33, %s3473_s14  ;;  %v1181_v33 = vpop.permute.xlu0 %1180  ;;  %s3479_s14 = smov 20  }
 0x4d1   : > { %1916 = vadd.xlane.f32.xlu0 %v1915_v27  ;;  %1913 = vadd.xlane.f32.xlu1 %v1912_v32 }
 0x50b   : > { %v1896_v41 = vpop.xlane.xlu0 %1895 }
 0x50c   : > { %3366 = vrcp.f32 %v1896_v41 }
 0x510   : > { %v1902_v60 = vpop.xlane.xlu1 %1901 }
 0x511   : > { %3368 = vrcp.f32 %v1902_v60 }
 0x515   : > { %v1899_v61 = vpop.xlane.xlu1 %1898 }
 0x516   : > { %3370 = vrcp.f32 %v1899_v61 }
 0x519   : > { %v3367_v4 = vpop.eup %3366 }
 0x51a   : > { %v1926_v36 = vmul.f32 %v3367_v4, %v3351_v40 }
 0x51c   : > { %v1934_v11 = vpack.c.bf16 %v1926_v36, %v1926_v36 }
 0x51e   : > { %v3369_v12 = vpop.eup %3368  ;;  %3178 = vmatmul.mubr.msk.bf16.vlgmr.msra.gmra.mxu1 %vm1845_vm4, %v1934_v11 }
 0x51f   : > { %3188 = vmatpush3.bf16.msra.mxu1 %v2039_v13  ;;  %3189 = vmatprep.mubr.msk.bf16.mxu1 %vm3464_vm1, %v3463_v8  ;;  %v1928_v17 = vmul.f32 %v3369_v12, %v3353_v46 }
 0x520   : > { %3199 = vmatprep.subr.bf16.mxu1 %v3463_v8 }
 0x521   : > { %v1908_v21 = vpop.xlane.xlu0 %1907  ;;  %v1936_v10 = vpack.c.bf16 %v1928_v17, %v1928_v17 }
 0x523   : > { %v3371_v9 = vpop.eup %3370 }
 0x524   : > { %v1927_v19 = vmul.f32 %v3371_v9, %v3355_v52 }
 0x525   : > { %v1905_v20 = vpop.xlane.xlu0 %1904  ;;  %v1911_v18 = vpop.xlane.xlu1 %1910 }
 0x526   : > { %3190 = vmatmul.mubr.msk.bf16.vlgmr.msra.gmra.mxu1 %vm1845_vm4, %v1936_v10  ;;  %3372 = vrcp.f32 %v1905_v20  ;;  %v1935_v22 = vpack.c.bf16 %v1927_v19, %v1927_v19 }
 0x527   : > { %3201 = vmatprep.mubr.msk.bf16.mxu1 %vm3464_vm1, %v3463_v8  ;;  %3374 = vrcp.f32 %v1908_v21 }
 0x528   : > { %3184 = vmatmul.mubr.msk.bf16.vlgmr.msra.gmra.mxu0 %vm1845_vm4, %v1935_v22  ;;  %3376 = vrcp.f32 %v1911_v18 }
 0x529   : > { %v1187_v25 = vpop.permute.xlu0 %1186  ;;  %3194 = vmatpush3.bf16.msra.mxu0 %v2085_v23  ;;  %v1185_v16 = vpop.permute.xlu1 %1184  ;;  %3195 = vmatprep.mubr.msk.bf16.mxu0 %vm3464_vm1, %v3463_v8 }
 0x52a   : > { %v1244_v15 = vcombine.low %v1183_v42, %v1187_v25  ;;  %v1245_v29 = vcombine.high %v1183_v42, %v1187_v25  ;;  %v1228_v34 = vcombine.low %v1181_v33, %v1185_v16  ;;  %v1229_v35 = vcombine.high %v1181_v33, %v1185_v16  ;;  %3205 = vmatprep.subr.bf16.mxu0 %v3463_v8 }
 0x52c   : > { %v1252_v38 = vrot.slane %v1244_v15, %v3672_v44  ;;  %v1259_v39 = vrot.slane %v1245_v29, %v3672_v44  ;;  %v1236_v28 = vrot.slane %v1228_v34, %v3672_v44  ;;  %v1243_v40 = vrot.slane %v1229_v35, %v3672_v44 }
 0x52e   : > { %v1292_v43 = vcombine.low %v1236_v28, %v1252_v38  ;;  %v1293_v45 = vcombine.high %v1236_v28, %v1252_v38  ;;  %v1308_v31 = vcombine.low %v1243_v40, %v1259_v39  ;;  %v1309_v46 = vcombine.high %v1243_v40, %v1259_v39 }
 0x530   : > { %v1300_v30 = vrot.slane %v1292_v43, %v3674_v51  ;;  %v1307_v47 = vrot.slane %v1293_v45, %v3674_v51  ;;  %v1316_v14 = vrot.slane %v1308_v31, %v3674_v51  ;;  %v1323_v24 = vrot.slane %v1309_v46, %v3674_v51 }
 0x532   : > { %v3015_v48 = vcombine.low %v1300_v30, %v1307_v47  ;;  %v3017_v49 = vcombine.high %v1300_v30, %v1307_v47  ;;  %v3019_v50 = vcombine.low %v1316_v14, %v1323_v24  ;;  %v3021_v52 = vcombine.high %v1316_v14, %v1323_v24 }
 0x533   : > { %v3373_v53 = vpop.eup %3372 }
 0x534   : > { %v1347_v54 = vrot.slane %v3015_v48, %v3672_v44  ;;  %v1363_v56 = vrot.slane %v3017_v49, %v3672_v44  ;;  %v1379_v63 = vrot.slane %v3019_v50, %v3672_v44  ;;  %v1395_v58 = vrot.slane %v3021_v52, %v3672_v44  ;;  %v3375_v0 = vpop.eup %3374 }
 0x535   : > { %v1929_v59 = vmul.f32 %v3373_v53, %v3896_v57  ;;  %v3377_v32 = vpop.eup %3376  ;;  %v1930_v12 = vmul.f32 %v3375_v0, %v3892_v55 }
 0x536   : > { %v1412_v1 = vcombine.low %v1347_v54, %v1363_v56  ;;  %v1444_v2 = vcombine.low %v1379_v63, %v1395_v58  ;;  %v1413_v3 = vcombine.high %v1347_v54, %v1363_v56  ;;  %v1445_v5 = vcombine.high %v1379_v63, %v1395_v58 }
 0x537   : > { %v1937_v27 = vpack.c.bf16 %v1929_v59, %v1929_v59  ;;  %v1931_v13 = vmul.f32 %v3377_v32, %v3898_v62  ;;  %v1938_v19 = vpack.c.bf16 %v1930_v12, %v1930_v12 }
 0x538   : > { %v1420_v33 = vrot.slane %v1412_v1, %v3674_v51  ;;  %v1452_v41 = vrot.slane %v1444_v2, %v3674_v51  ;;  %v1427_v42 = vrot.slane %v1413_v3, %v3674_v51  ;;  %v1459_v60 = vrot.slane %v1445_v5, %v3674_v51 }
 0x539   : > { %3196 = vmatmul.mubr.msk.bf16.vlgmr.msra.gmra.mxu0 %vm1845_vm4, %v1937_v27  ;;  %v1939_v26 = vpack.c.bf16 %v1931_v13, %v1931_v13 }
 0x53a   : > { %v1464_v61 = vcombine.low %v1420_v33, %v1452_v41  ;;  %v1465_v4 = vcombine.high %v1420_v33, %v1452_v41  ;;  %3207 = vmatprep.mubr.msk.bf16.mxu0 %vm3464_vm1, %v3463_v8  ;;  %v1466_v57 = vcombine.low %v1427_v42, %v1459_v60  ;;  %v1467_v36 = vcombine.high %v1427_v42, %v1459_v60 }
 0x53c   : > { %v1472_v37 = vpack.c.bf16 %v1464_v61, %v1464_v61  ;;  %v1473_v11 = vpack.c.bf16 %v1465_v4, %v1465_v4  ;;  %v1474_v9 = vpack.c.bf16 %v1466_v57, %v1466_v57  ;;  %v1475_v10 = vpack.c.bf16 %v1467_v36, %v1467_v36 }
 0x53e   : > { %v2131_v17 = vsel %vm1945_vm3, %v1472_v37, 0  ;;  %v2177_v21 = vsel %vm1945_vm3, %v1473_v11, 0  ;;  %v2223_v55 = vsel %vm1945_vm3, %v1474_v9, 0  ;;  %v2269_v62 = vsel %vm1945_vm3, %v1475_v10, 0 }
 0x53f   : > { %3200 = vmatpush3.bf16.msra.mxu1 %v2131_v17  ;;  %3206 = vmatpush3.bf16.msra.mxu0 %v2177_v21 }
 0x540   : > { %3211 = vmatprep.subr.bf16.mxu1 %v3463_v8  ;;  %3217 = vmatprep.subr.bf16.mxu0 %v3463_v8 }
 0x542   : > { %3202 = vmatmul.mubr.msk.bf16.vlgmr.msra.gmra.mxu1 %vm1845_vm4, %v1938_v19  ;;  %3208 = vmatmul.mubr.msk.bf16.vlgmr.msra.gmra.mxu0 %vm1845_vm4, %v1939_v26 }
 0x543   : > { %3212 = vmatpush3.bf16.msra.mxu1 %v2223_v55  ;;  %3218 = vmatpush3.bf16.msra.mxu0 %v2269_v62 }
 0x544   : > { %3219 = vmatprep.mubr.msk.bf16.mxu0 %vm3464_vm1, %v3463_v8  ;;  %3213 = vmatprep.mubr.msk.bf16.mxu1 %vm3464_vm1, %v3463_v8 }
 0x545   : > { %3223 = vmatprep.subr.bf16.mxu1 %v3463_v8  ;;  %3231 = vmatprep.subr.bf16.mxu0 %v3463_v8 }
 0x55a   : > { %v1917_v20 = vpop.xlane.xlu0 %1916  ;;  %v1914_v18 = vpop.xlane.xlu1 %1913 }
 0x55b   : > { %3378 = vrcp.f32 %v1917_v20 }
 0x55c   : > { %3380 = vrcp.f32 %v1914_v18 }
 0x568   : > { %v3379_v22 = vpop.eup %3378 }
 0x569   : > { %v3381_v23 = vpop.eup %3380  ;;  %v1933_v25 = vmul.f32 %v3379_v22, %v3911_v7 }
 0x56a   : > { %v1932_v16 = vmul.f32 %v3381_v23, %v3909_v6 }
 0x56b   : > { %v1941_v15 = vpack.c.bf16 %v1933_v25, %v1933_v25 }
 0x56c   : > { %v1940_v29 = vpack.c.bf16 %v1932_v16, %v1932_v16 }
 0x56d   : > { %3220 = vmatmul.mubr.msk.bf16.vlgmr.msra.gmra.mxu0 %vm1845_vm4, %v1941_v15 }
 0x56e   : > { %3214 = vmatmul.mubr.msk.bf16.vlgmr.msra.gmra.mxu1 %vm1845_vm4, %v1940_v29  ;;  %3235 = vmatprep.mubr.msk.bf16.mxu0 %vm3464_vm1, %v3463_v8 }
 0x56f   : > { %3227 = vmatprep.mubr.msk.bf16.mxu1 %vm3464_vm1, %v3463_v8 }
 0x5de   : > { %v1983_v34 = vpop.f32.mrf.mxu1 }
 0x5e0   : > { %v3179_v35 = vpop.f32.mrf.mxu1 }
 0x5e2   : > { %v1986_v38 = vpop.f32.mrf.mxu1 }
 0x5e4   : > { %v3180_v39 = vpop.f32.mrf.mxu1 }
 0x5e6   : > { %v2075_v28 = vpop.f32.mrf.mxu1 }
 0x5e7   : > { %v2311_v30 = vcombine.low %v1983_v34, %v2075_v28  ;;  %v2312_v47 = vcombine.high %v1983_v34, %v2075_v28 }
 0x5e8   : > { %v3191_v7 = vpop.f32.mrf.mxu1  ;;  %v2029_v40 = vpop.f32.mrf.mxu0 }
 0x5e9   : > { %v2319_v50 = vrot.slane %v2311_v30, %v3672_v44  ;;  %v2326_v52 = vrot.slane %v2312_v47, %v3672_v44 }
 0x5ea   : > { %v2078_v6 = vpop.f32.mrf.mxu1  ;;  %v3185_v43 = vpop.f32.mrf.mxu0 }
 0x5ec   : > { %v3192_v45 = vpop.f32.mrf.mxu1  ;;  %v2032_v31 = vpop.f32.mrf.mxu0 }
 0x5ee   : > { %v3186_v46 = vpop.f32.mrf.mxu0 }
 0x5f9   : > { %v2121_v14 = vpop.f32.mrf.mxu0 }
 0x5fa   : > { %v2327_v24 = vcombine.low %v2029_v40, %v2121_v14  ;;  %v2328_v48 = vcombine.high %v2029_v40, %v2121_v14 }
 0x5fb   : > { %v3197_v49 = vpop.f32.mrf.mxu0 }
 0x5fc   : > { %v2335_v53 = vrot.slane %v2327_v24, %v3672_v44  ;;  %v2342_v54 = vrot.slane %v2328_v48, %v3672_v44 }
 0x5fd   : > { %v2124_v56 = vpop.f32.mrf.mxu0 }
 0x5fe   : > { %v2375_v63 = vcombine.low %v2319_v50, %v2335_v53  ;;  %v2376_v58 = vcombine.high %v2319_v50, %v2335_v53  ;;  %v2391_v59 = vcombine.low %v2326_v52, %v2342_v54  ;;  %v2392_v0 = vcombine.high %v2326_v52, %v2342_v54  ;;  %v3336_v52 = vld [vmem:[%s4153_s5 + $0x8] sm:$0xff]  }
 0x5ff   : > { %v3198_v1 = vpop.f32.mrf.mxu0  ;;  %3224 = vmatpush3.bf16.msra.mxu1 %v3336_v52 }
 0x600   : > { %v2383_v2 = vrot.slane %v2375_v63, %v3674_v51  ;;  %v2390_v3 = vrot.slane %v2376_v58, %v3674_v51  ;;  %v2399_v5 = vrot.slane %v2391_v59, %v3674_v51  ;;  %v2406_v27 = vrot.slane %v2392_v0, %v3674_v51  ;;  %3225 = vmatprep.subr.bf16.mxu1 %v3463_v8 }
 0x602   : > { %v3038_v32 = vcombine.low %v2383_v2, %v2390_v3  ;;  %v3040_v33 = vcombine.high %v2383_v2, %v2390_v3  ;;  %v3042_v41 = vcombine.low %v2399_v5, %v2406_v27  ;;  %v3044_v42 = vcombine.high %v2399_v5, %v2406_v27  ;;  %v2167_v60 = vpop.f32.mrf.mxu1  ;;  %v2213_v61 = vpop.f32.mrf.mxu0 }
 0x604   : > { %v3203_v4 = vpop.f32.mrf.mxu1  ;;  %v3209_v57 = vpop.f32.mrf.mxu0  ;;  %v2455_v36 = vrot.slane %v3038_v32, %v3672_v44  ;;  %v2471_v37 = vrot.slane %v3040_v33, %v3672_v44  ;;  %v2487_v11 = vrot.slane %v3042_v41, %v3672_v44  ;;  %v2503_v12 = vrot.slane %v3044_v42, %v3672_v44  ;;  %v3337_v32 = vld [vmem:[%s4153_s5] sm:$0xff]  }
 0x605   : > { %3226 = vmatpush3.bf16.msra.mxu1 %v3337_v32 }
 0x606   : > { %v2170_v13 = vpop.f32.mrf.mxu1  ;;  %v2216_v17 = vpop.f32.mrf.mxu0  ;;  %v2512_v21 = vcombine.high %v2455_v36, %v2471_v37  ;;  %v2544_v9 = vcombine.high %v2487_v11, %v2503_v12  ;;  %v2511_v10 = vcombine.low %v2455_v36, %v2471_v37  ;;  %v2543_v19 = vcombine.low %v2487_v11, %v2503_v12  ;;  %3239 = vmatprep.subr.bf16.mxu1 %v3463_v8 }
 0x608   : > { %v2526_v26 = vrot.slane %v2512_v21, %v3674_v51  ;;  %v2558_v55 = vrot.slane %v2544_v9, %v3674_v51  ;;  %v3993_v62 = vrot.slane %v2511_v10, %v3674_v51  ;;  %v3996_v20 = vrot.slane %v2543_v19, %v3674_v51  ;;  %v3204_v18 = vpop.f32.mrf.mxu1  ;;  %v3210_v22 = vpop.f32.mrf.mxu0 }
 0x60a   : > { %v2577_v23 = vcombine.low %v2526_v26, %v2558_v55  ;;  %v2576_v25 = vcombine.high %v3993_v62, %v3996_v20  ;;  %v2575_v16 = vcombine.low %v3993_v62, %v3996_v20  ;;  %v2578_v15 = vcombine.high %v2526_v26, %v2558_v55 }
 0x60c   : > { %2588 = vrot.lane.b32.xlu1 %v2577_v23, %s3476_s0  ;;  %2584 = vrot.lane.b32.xlu0 %v2576_v25, %s3477_s1  ;;  %s3480_s0 = smov 16   ;;  %s3481_s1 = smov 28  }
 0x610   : > { %2592 = vrot.lane.b32.xlu1 %v2578_v15, %s3478_s24  ;;  %s3482_s24 = smov 24  }
 0x62d   : > { %v2305_v29 = vpop.f32.mrf.mxu0 }
 0x62e   : > { %v2359_v34 = vcombine.low %v2213_v61, %v2305_v29  ;;  %v2360_v35 = vcombine.high %v2213_v61, %v2305_v29  ;;  %v2259_v38 = vpop.f32.mrf.mxu1 }
 0x62f   : > { %v3221_v39 = vpop.f32.mrf.mxu0  ;;  %v2343_v28 = vcombine.low %v2167_v60, %v2259_v38  ;;  %v2344_v7 = vcombine.high %v2167_v60, %v2259_v38 }
 0x630   : > { %v3215_v40 = vpop.f32.mrf.mxu1  ;;  %v2367_v6 = vrot.slane %v2359_v34, %v3672_v44  ;;  %v2374_v43 = vrot.slane %v2360_v35, %v3672_v44  ;;  %v3384_v35 = vld [vmem:[%s3614_s15] sm:$0xff]  ;;  %s3389_s15 = sshll.u32 %s3483_s23, 4  ;;  %s3390_s15 = int_to_ptr.vmem [resolvable:$false] %s3389_s15 }
 0x631   : > { %v2351_v45 = vrot.slane %v2343_v28, %v3672_v44  ;;  %v2358_v31 = vrot.slane %v2344_v7, %v3672_v44  ;;  %v2308_v46 = vpop.f32.mrf.mxu0 }
 0x632   : > { %v2262_v30 = vpop.f32.mrf.mxu1  ;;  %v3338_v46 = vld [vmem:[%s4157_s9 + $0x8] sm:$0xff]  }
 0x633   : > { %v2407_v47 = vcombine.low %v2351_v45, %v2367_v6  ;;  %v2408_v14 = vcombine.high %v2351_v45, %v2367_v6  ;;  %v2423_v24 = vcombine.low %v2358_v31, %v2374_v43  ;;  %v2424_v48 = vcombine.high %v2358_v31, %v2374_v43  ;;  %v3222_v49 = vpop.f32.mrf.mxu0  ;;  %3232 = vmatpush3.bf16.msra.mxu0 %v3338_v46  ;;  %v3339_v30 = vld [vmem:[%s4157_s9] sm:$0xff]  }
 0x634   : > { %v3216_v50 = vpop.f32.mrf.mxu1  ;;  %3233 = vmatprep.subr.bf16.mxu0 %v3463_v8  ;;  %v3344_v49 = vld [vmem:[%s4159_s11 + $0x18] sm:$0xff]  }
 0x635   : > { %v2415_v53 = vrot.slane %v2407_v47, %v3674_v51  ;;  %v2422_v54 = vrot.slane %v2408_v14, %v3674_v51  ;;  %v2431_v56 = vrot.slane %v2423_v24, %v3674_v51  ;;  %v2438_v63 = vrot.slane %v2424_v48, %v3674_v51  ;;  %v3340_v47 = vld [vmem:[%s4159_s11 + $0x38] sm:$0xff]   ;;  %v3341_v14 = vld [vmem:[%s4159_s11 + $0x30] sm:$0xff]   ;;  %v3342_v24 = vld [vmem:[%s4159_s11 + $0x28] sm:$0xff]  }
 0x636   : > { %v3343_v48 = vld [vmem:[%s4159_s11 + $0x20] sm:$0xff]   ;;  %v3345_v50 = vld [vmem:[%s4159_s11 + $0x10] sm:$0xff]  }
 0x637   : > { %v3039_v58 = vcombine.low %v2415_v53, %v2422_v54  ;;  %v3041_v59 = vcombine.high %v2415_v53, %v2422_v54  ;;  %v3043_v0 = vcombine.low %v2431_v56, %v2438_v63  ;;  %v3045_v1 = vcombine.high %v2431_v56, %v2438_v63  ;;  %3234 = vmatpush3.bf16.msra.mxu0 %v3339_v30  ;;  %v3050_v63 = vld [vmem:[%s4155_s7] ss:$0 sm:$0xff] }
 0x639   : > { %v2462_v2 = vrot.slane %v3039_v58, %v3672_v44  ;;  %v2478_v3 = vrot.slane %v3041_v59, %v3672_v44  ;;  %v2494_v5 = vrot.slane %v3043_v0, %v3672_v44  ;;  %v2510_v27 = vrot.slane %v3045_v1, %v3672_v44  ;;  %v3051_v59 = vld [vmem:[%s4156_s8] ss:$0 sm:$0xff] }
 0x63b   : > { %v2527_v33 = vcombine.low %v2462_v2, %v2478_v3  ;;  %v2559_v41 = vcombine.low %v2494_v5, %v2510_v27  ;;  %v2528_v42 = vcombine.high %v2462_v2, %v2478_v3  ;;  %v2560_v60 = vcombine.high %v2494_v5, %v2510_v27  ;;  %v3346_v3 = vld [vmem:[%s4159_s11 + $0x8] sm:$0xff]   ;;  %v3347_v5 = vld [vmem:[%s4159_s11] sm:$0xff]  }
 0x63c   : > { %v3052_v27 = vld [vmem:[%s4158_s10] ss:$0 sm:$0xff] }
 0x63d   : > { %v2535_v61 = vrot.slane %v2527_v33, %v3674_v51  ;;  %v2567_v4 = vrot.slane %v2559_v41, %v3674_v51  ;;  %v2542_v37 = vrot.slane %v2528_v42, %v3674_v51  ;;  %v2574_v44 = vrot.slane %v2560_v60, %v3674_v51 }
 0x63f   : > { %v2580_v57 = vcombine.high %v2535_v61, %v2567_v4  ;;  %v2579_v36 = vcombine.low %v2535_v61, %v2567_v4  ;;  %v2582_v11 = vcombine.high %v2542_v37, %v2574_v44  ;;  %v2581_v12 = vcombine.low %v2542_v37, %v2574_v44 }
 0x641   : > { %2600 = vrot.lane.b32.xlu1 %v2580_v57, %s3479_s14  ;;  %2596 = vrot.lane.b32.xlu0 %v2579_v36, %s3480_s0  ;;  %v3056_v57 = vld [vmem:[%s4160_s12] ss:$0 sm:$0xff]  ;;  %s3066_s14 = sshll.u32 %s3453_s28, 7  ;;  %s445_s0 = scalar_lea.vmem [#allocation2], %s2990_s22 }
 0x642   : > { %s4101_s2 = scalar_lea.hbm %s4161_s13, %s3066_s14  ;;  %s2903_s28 = scalar_lea.sflag [#allocation3], %s443_s19 }
 0x643   : > { %s3391_s14 = scalar_lea.vmem %s3390_s15, 256 }
 0x645   : > { %2608 = vrot.lane.b32.xlu1 %v2582_v11, %s3481_s1  ;;  %2604 = vrot.lane.b32.xlu0 %v2581_v12, %s3482_s24  ;;  %s2917_s1 = sshll.u32 %s445_s0, 4  ;;  %s4103_s1 = int_to_ptr.vmem [resolvable:$true] %s2917_s1 }
 0x646   : > { %s3385_s22 = scalar_lea.vmem %s4103_s1, 128  ;;  %p3392_p1 = scmp.lt.s32.totalorder %s4103_s1, %s3390_s15 }
 0x647   : > { %p3386_p12 = scmp.ne.s32.totalorder %s4103_s1, %s3385_s22  ;;  %p3393_p2 = scmp.lt.s32.totalorder %s3391_s14, %s3385_s22 }
 0x649   : > { %p3387_p13 = pnand %p3386_p12, %p3594_p4  ;;  %p3394_p3 = por %p3393_p2, %p3392_p1 }
 0x64b   : > { %p3388_p0 = pneg %p3387_p13 }
 0x64d   : > { %p3395_p5 = pnand %p3394_p3, %p3388_p0 }
 0x67e   : > { %v2589_v13 = vpop.permute.xlu1 %2588  ;;  %v2585_v17 = vpop.permute.xlu0 %2584 }
 0x67f   : > { %v2611_v21 = vsel %vm1476_vm2, %v2575_v16, %v2585_v17  ;;  %v3046_v16 = vld [vmem:[%s4154_s6] ss:$0 sm:$0xff] }
 0x680   : > { %v2612_v51 = vsel %vm1845_vm4, %v2611_v21, %v2589_v13 }
 0x682   : > { %v2593_v9 = vpop.permute.xlu1 %2592 }
 0x683   : > { %v2614_v10 = vsel %vm2613_vm5, %v2612_v51, %v2593_v9 }
 0x6b3   : > { %v2601_v19 = vpop.permute.xlu1 %2600  ;;  %v2597_v26 = vpop.permute.xlu0 %2596 }
 0x6b4   : > { %v2616_v55 = vsel %vm2615_vm6, %v2614_v10, %v2597_v26 }
 0x6b5   : > { %v2618_v22 = vsel %vm2617_vm7, %v2616_v55, %v2601_v19 }
 0x6b7   : > { %v2609_v18 = vpop.permute.xlu1 %2608  ;;  %v2605_v23 = vpop.permute.xlu0 %2604 }
 0x6b8   : > { %v2620_v25 = vsel %vm2619_vm8, %v2618_v22, %v2605_v23 }
 0x6b9   : > { %v2622_v62 = vsel %vm2621_vm9, %v2620_v25, %v2609_v18 }
 0x6ba   : > { %v2623_v20 = vpack.c.bf16 %v2622_v62, %v2622_v62 }
 0x6bc   : > { %3228 = vmatmul.mubr.msk.bf16.vlgmr.msra.gmra.mxu1 %vm452_vm0, %v2623_v20 }
 0x6bd   : > { %3255 = vmatprep.mubr.msk.bf16.mxu1 %vm3464_vm1, %v3463_v8  ;;  %3240 = vmatpush3.bf16.msra.mxu1 %v3340_v47 }
 0x6be   : > { %3241 = vmatprep.subr.bf16.mxu1 %v3463_v8 }
 0x6c1   : > { %3242 = vmatpush3.bf16.msra.mxu1 %v3341_v14 }
 0x6c2   : > { %3243 = vmatprep.subr.bf16.mxu1 %v3463_v8 }
 0x6c5   : > { %3244 = vmatpush3.bf16.msra.mxu1 %v3342_v24 }
 0x6c6   : > { %3245 = vmatprep.subr.bf16.mxu1 %v3463_v8 }
 0x6c9   : > { %3246 = vmatpush3.bf16.msra.mxu1 %v3343_v48 }
 0x6ca   : > { %3247 = vmatprep.subr.bf16.mxu1 %v3463_v8 }
 0x6cd   : > { %3248 = vmatpush3.bf16.msra.mxu1 %v3344_v49 }
 0x6ce   : > { %3249 = vmatprep.subr.bf16.mxu1 %v3463_v8 }
 0x6d1   : > { %3250 = vmatpush3.bf16.msra.mxu1 %v3345_v50 }
 0x6d2   : > { %3251 = vmatprep.subr.bf16.mxu1 %v3463_v8 }
 0x6d5   : > { %3252 = vmatpush3.bf16.msra.mxu1 %v3346_v3 }
 0x6d6   : > { %3253 = vmatprep.subr.bf16.mxu1 %v3463_v8 }
 0x6d9   : > { %3254 = vmatpush3.bf16.msra.mxu1 %v3347_v5 }
 0x77c   : > { %v2684_v15 = vpop.f32.mrf.mxu1 }
 0x77d   : > { %v2685_v29 = vadd.f32 %v3046_v16, %v2684_v15 }
 0x77e   : > { %v3229_v34 = vpop.f32.mrf.mxu1 }
 0x77f   : > { %v4038_v38 = vadd.f32 %v3384_v35, %v2685_v29 }
 0x780   : > { %v2687_v39 = vpop.f32.mrf.mxu1 }
 0x781   : > { %v2691_v28 = vsel %vm452_vm0, %v4038_v38, 0.0 }
 0x782   : > { %2692 = vadd.xlane.f32.xlu0 %v2691_v28  ;;  %v3230_v7 = vpop.f32.mrf.mxu1 }
 0x80b   : > { %v2693_v40 = vpop.xlane.xlu0 %2692 }
 0x80c   : > { %v2694_v6 = vmul.f32 0.03125, %v2693_v40 }
 0x80e   : > { %v2695_v43 = vsub.f32 %v4038_v38, %v2694_v6 }
 0x810   : > { %v2696_v45 = vmul.f32 %v2695_v43, %v2695_v43 }
 0x812   : > { %v2697_v31 = vsel %vm452_vm0, %v2696_v45, 0.0 }
 0x813   : > { %2698 = vadd.xlane.f32.xlu1 %v2697_v31 }
 0x89c   : > { %v2699_v52 = vpop.xlane.xlu1 %2698 }
 0x89d   : > { %v2700_v53 = vmul.f32 0.03125, %v2699_v52 }
 0x89f   : > { %v2701_v54 = vadd.f32 1e-06, %v2700_v53 }
 0x8a1   : > { %3382 = vrsqrt.f32 %v2701_v54 }
 0x8ae   : > { %v3383_v56 = vpop.eup %3382 }
 0x8af   : > { %v2703_v58 = vmul.f32 %v3383_v56, %v2695_v43 }
 0x8b1   : > { %v2711_v0 = vmul.f32 %v3050_v63, %v2703_v58 }
 0x8b3   : > { %v2719_v1 = vadd.f32 %v3051_v59, %v2711_v0 }
 0x8b5   : > { %v2720_v2 = vpack.c.bf16 %v2719_v1, %v2719_v1 }
 0x8b7   : > { %3236 = vmatmul.mubr.msk.bf16.vlgmr.msra.gmra.mxu0 %vm452_vm0, %v2720_v2 }
 0x977   : > { %v2781_v32 = vpop.f32.mrf.mxu0 }
 0x978   : > { %v2782_v33 = vadd.f32 %v3052_v27, %v2781_v32 }
 0x979   : > { %v3237_v41 = vpop.f32.mrf.mxu0 }
 0x97a   : > { %v2787_v42 = vmax.f32 %v2782_v33, 0.0 }
 0x97b   : > { %v2784_v60 = vpop.f32.mrf.mxu0 }
 0x97c   : > { %v2788_v61 = vpack.c.bf16 %v2787_v42, %v2787_v42 }
 0x97d   : > { %v3238_v4 = vpop.f32.mrf.mxu0 }
 0x97e   : > { %3256 = vmatmul.mubr.bf16.vlgmr.msra.gmra.mxu1 %v2788_v61 }
 0xa3e   : > { %v2894_v8 = vpop.f32.mrf.mxu1 }
 0xa3f   : > { %v2895_v36 = vadd.f32 %v3056_v57, %v2894_v8 }
 0xa40   : > { %v3257_v37 = vpop.f32.mrf.mxu1 }
 0xa41   : > { %v2900_v44 = vadd.f32 %v2895_v36, %v4038_v38 }
 0xa42   : > { %v2897_v11 = vpop.f32.mrf.mxu1 }
 0xa43   : > { %2901 = vst.msk [vmem:[%s445_s0] sm:$0xff] %vm452_vm0, %v2900_v44 }
 0xa44   : > { %v3258_v12 = vpop.f32.mrf.mxu1 }
 0xa45   : > { %3398 = shalt.err (!%p3395_p5)
}
 0xa46   : > { %s3399_s0 = scalar_lea.hbm %s4101_s2, 128  ;;  %s3403_s17 = scalar_lea.hbm %s4161_s13, 256 }
 0xa47   : > { %p3400_p6 = scmp.ne.s32.totalorder %s4101_s2, %s3399_s0  ;;  %p3404_p10 = scmp.lt.s32.totalorder %s4101_s2, %s4161_s13 }
 0xa48   : > { %p3405_p11 = scmp.lt.s32.totalorder %s3403_s17, %s3399_s0 }
 0xa49   : > { %p3401_p7 = pnand %p3400_p6, %p3594_p4 }
 0xa4a   : > { %p3406_p12 = por %p3405_p11, %p3404_p10 }
 0xa4b   : > { %p3402_p9 = pneg %p3401_p7 }
 0xa4d   : > { %p3407_p13 = pnand %p3406_p12, %p3402_p9 }
 0xa4f   : > { %3410 = shalt.err (!%p3407_p13)
}
 0xa50   : > { %3259 = dma.vmem_to_hbm [thread:$0]  (%p3594_p4), %s4103_s1, 128, %s4101_s2, %s2903_s28  }
 0xa51 PF: > { %p3265_p0 = scmp.ge.s32.totalorder %s3461_s30, 2  ;;  %s2929_s22 = sand.u32 1, %s3441_s25  }
 0xa52   : > { %s2930_s3 = scalar_lea.sflag [#allocation3], %s2929_s22 }
 0xa53   : > { %p3262_p1 = pnand %p3265_p0, %p3601_p8 }
 0xa55   : > { %p3263_p2 = pneg %p3262_p1 }
 0xa57   : > { %3436 = dma.done.wait (%p3263_p2), %s2930_s3, 128  }
 0xa58   : > { %3438 = vsyncadd (%p3263_p2), %s2930_s3, 4294967168  ;;  %s26_s30 = sadd.s32 1, %s3461_s30   ;;  %s4172_s25 = smov %s3445_s26 }
 0xa59   : > { %p23_p3 = scmp.ge.s32.totalorder %s26_s30, 4   ;;  %s4173_s26 = smov %s3449_s27 }
 0xa5a   : > { %s4174_s27 = smov %s3607_s21  ;;  %s4175_s28 = smov %s3457_s29 }
 0xa5b   : > { %s4176_s29 = smov %s4178_s16  ;;  %25 = sbr.rel (!%p23_p3) target bundleno = 9 (0x9), region = 107 }
 0xa60   :  { %2935 = vsyncpa [#allocation3], 1 }
 0xa61   :  { %2937 = vsyncpa [#allocation3 + $0x1], 1 }

</bundles_post_ra>
